<compile_context>
chip_gen: v7x
topology: tpu7x:2x2x1
jax: 0.10.0
libtpu: 0.0.40
codegen_flags: <defaults>
</compile_context>

<pallas_src>
import functools

import jax
import jax.numpy as jnp
import numpy as np
from jax import lax
from jax.experimental import pallas as pl
from jax.experimental.pallas import tpu as pltpu


def _leaky(x, slope=0.2):
    return jnp.where(x >= 0, x, slope * x)


def d_group_kernel(x_ref, wrgb_ref, brgb_ref, wc3m_ref, wc3s_ref, bc3_ref,
                   w4_ref, bc4_ref, wfc_ref, bfc_ref,
                   valid9_ref, vmask9c_ref, colmask_ref, gsum_ref,
                   out_ref, *, G, H, W, C):
    HW = H * W
    GHW = G * HW

    # ---- FromRGB: 1x1 conv == channel matmul -------------------------------
    x = x_ref[...]                                              # (GHW, rgb)
    h = jnp.dot(x, wrgb_ref[...], preferred_element_type=jnp.float32)
    h = h + brgb_ref[...]                                       # (GHW, C)

    # ---- MiniBatchSTD (ProGAN-style): biased std over the group per (h,w,c),
    #      eps inside sqrt, then averaged over (H,W,C) -> one scalar/group ----
    imgs = [h[g * HW:(g + 1) * HW, :] for g in range(G)]        # aligned slices
    mu = sum(imgs) / G
    var = sum([(b - mu) ** 2 for b in imgs]) / G
    s = jnp.mean(jnp.sqrt(var + 1e-8))                          # scalar

    # ---- 3x3 conv, stride 1, pad 1: 9 rolled taps fused into ONE matmul ----
    # pltpu.roll wraps rows, but every wrapped row corresponds to a tap that
    # leaves the HxW image, so the precomputed validity mask zeroes it.
    taps = []
    for ky in range(3):
        for kx in range(3):
            k = (ky - 1) * W + (kx - 1)                         # flat row shift
            sh = h if k == 0 else pltpu.roll(h, shift=(-k) % GHW, axis=0)
            taps.append(sh)
    big = jnp.concatenate(taps, axis=-1) * vmask9c_ref[...]     # (GHW, 9*C)
    acc = jnp.dot(big, wc3m_ref[...], preferred_element_type=jnp.float32)
    # std channel is spatially constant: its 3x3-conv output is
    # s * (per-pixel valid-tap mask @ std-channel weight rows)
    std_contrib = s * jnp.dot(valid9_ref[...], wc3s_ref[...],
                              preferred_element_type=jnp.float32)
    h3 = _leaky(acc + std_contrib + bc3_ref[...])               # (GHW, C)

    # ---- 4x4 conv, valid (kernel == spatial extent) ------------------------
    # Row-dependent weight selection via a precomputed 0/1 column mask, then a
    # per-image (group-sum) matmul: 2 MXU ops instead of 16 one-hot matmuls.
    tiled = jnp.concatenate([h3] * HW, axis=-1)                 # (GHW, HW*C)
    per_pix = jnp.dot(tiled * colmask_ref[...], w4_ref[...],
                      preferred_element_type=jnp.float32)       # (GHW, C)
    h4 = jnp.dot(gsum_ref[...], per_pix,
                 preferred_element_type=jnp.float32) + bc4_ref[...]  # (G, C)
    h4 = _leaky(h4)

    # ---- Flatten + Linear(C -> 1), written lane-dense as a (1, G) row ------
    out = jnp.einsum("oc,gc->og", wfc_ref[...], h4,
                     preferred_element_type=jnp.float32)        # (1, G)
    out_ref[...] = out + bfc_ref[...]


def _conv_constants(G, H, W, C):
    """Data-independent position masks, built host-side once."""
    HW = H * W
    GHW = G * HW
    m_idx = np.arange(GHW)
    y = (m_idx // W) % H
    x = m_idx % W
    valid9 = np.zeros((GHW, 9), np.float32)
    for ky in range(3):
        for kx in range(3):
            dy, dx = ky - 1, kx - 1
            valid9[:, ky * 3 + kx] = ((y + dy >= 0) & (y + dy < H) &
                                      (x + dx >= 0) & (x + dx < W))
    # broadcast of valid9 over channels: [m, tap*C + ci] = valid9[m, tap]
    vmask9c = np.repeat(valid9, C, axis=1).astype(np.float32)   # (GHW, 9*C)
    # column mask for the 4x4 conv: [m, p*C + ci] = (p == m % HW)
    p_idx = m_idx % HW
    colmask = np.repeat(np.eye(HW, dtype=np.float32)[p_idx, :], C, axis=1)
    # per-image group-sum matrix: [g, m] = (m // HW == g)
    gsum = (np.arange(G)[:, None] == (m_idx // HW)[None, :]).astype(np.float32)
    return (jnp.asarray(valid9), jnp.asarray(vmask9c),
            jnp.asarray(colmask), jnp.asarray(gsum))


def make_params(key, C=16, rgb=3):
    """Deterministic synthetic params in PyTorch weight layout, with the
    EqualizedLR runtime scale sqrt(2/fan_in) already folded in."""
    ks = jax.random.split(key, 8)

    def eqlr(k, shape, fan_in):
        w = jax.random.normal(k, shape, jnp.float32)
        return w * np.float32(np.sqrt(2.0 / fan_in))

    p = {}
    p["w_rgb"] = eqlr(ks[0], (C, rgb, 1, 1), rgb * 1 * 1)   # Conv2d(3, C, 1)
    p["b_rgb"] = 0.1 * jax.random.normal(ks[1], (C,), jnp.float32)
    p["w_c3"] = eqlr(ks[2], (C, C + 1, 3, 3), (C + 1) * 9)  # Conv2d(C+1, C, 3, 1, 1)
    p["b_c3"] = 0.1 * jax.random.normal(ks[3], (C,), jnp.float32)
    p["w_c4"] = eqlr(ks[4], (C, C, 4, 4), C * 16)           # Conv2d(C, C, 4, 1, 0)
    p["b_c4"] = 0.1 * jax.random.normal(ks[5], (C,), jnp.float32)
    p["w_fc"] = eqlr(ks[6], (1, C), C)                      # Linear(C, 1)
    p["b_fc"] = 0.1 * jax.random.normal(ks[7], (1,), jnp.float32)
    return p


def d_stabilization_forward(x_nchw, params, group_size=4):
    """Pallas-backed equivalent of D.stabilization_forward(x)."""
    N, RGB, H, W = x_nchw.shape
    C = params["w_rgb"].shape[0]
    G = min(group_size, N)
    assert N % G == 0, "minibatch-std requires N % group_size == 0"
    M = N // G
    HW = H * W
    GHW = G * HW

    # glue: NCHW -> NHWC -> (N*H*W, rgb); weights to matmul layouts
    x2d = jnp.transpose(x_nchw, (0, 2, 3, 1)).reshape(N * HW, RGB)
    x2d = x2d.astype(jnp.float32)
    w_rgb2d = jnp.transpose(params["w_rgb"], (2, 3, 1, 0)).reshape(RGB, C)
    w_c3 = jnp.transpose(params["w_c3"], (2, 3, 1, 0))          # (3,3,C+1,C)
    w_c3_main = w_c3[:, :, :C, :].reshape(9 * C, C)             # tap-major rows
    w_c3_std = w_c3[:, :, C, :].reshape(9, C)                   # std-channel rows
    w_c42d = jnp.transpose(params["w_c4"], (2, 3, 1, 0)).reshape(HW * C, C)
    w_fc2d = params["w_fc"].reshape(1, C)
    b_rgb2d = params["b_rgb"].reshape(1, C)
    b_c32d = params["b_c3"].reshape(1, C)
    b_c42d = params["b_c4"].reshape(1, C)
    b_fc2d = params["b_fc"].reshape(1, 1)

    valid9, vmask9c, colmask, gsum = _conv_constants(G, H, W, C)

    def full(shape):
        return pl.BlockSpec(shape, lambda m: (0, 0))

    out = pl.pallas_call(
        functools.partial(d_group_kernel, G=G, H=H, W=W, C=C),
        grid=(M,),
        out_shape=jax.ShapeDtypeStruct((M, G), jnp.float32),
        in_specs=[
            pl.BlockSpec((GHW, RGB), lambda m: (m, 0)),          # x, per group
            full((RGB, C)), full((1, C)),                        # FromRGB
            full((9 * C, C)), full((9, C)), full((1, C)),        # 3x3 conv
            full((HW * C, C)), full((1, C)),                     # 4x4 conv
            full((1, C)), full((1, 1)),                          # FC
            full((GHW, 9)), full((GHW, 9 * C)),                  # tap masks
            full((GHW, HW * C)), full((G, GHW)),                 # 4x4 constants
        ],
        out_specs=pl.BlockSpec((1, G), lambda m: (m, 0)),
        compiler_params=pltpu.CompilerParams(
            dimension_semantics=("parallel",)),
    )(x2d, w_rgb2d, b_rgb2d, w_c3_main, w_c3_std, b_c32d,
      w_c42d, b_c42d, w_fc2d, b_fc2d, valid9, vmask9c, colmask, gsum)
    return out.reshape(-1)                                       # x.view(-1)


def d_stabilization_forward_ref(x_nchw, params, group_size=4):
    """Pure-JAX reference (lax.conv, full f32 precision) for validation."""
    dn = ("NHWC", "HWIO", "NHWC")
    prec = lax.Precision.HIGHEST
    x = jnp.transpose(x_nchw, (0, 2, 3, 1)).astype(jnp.float32)
    w_rgb = jnp.transpose(params["w_rgb"], (2, 3, 1, 0))
    h = lax.conv_general_dilated(x, w_rgb, (1, 1), "VALID",
                                 dimension_numbers=dn,
                                 precision=prec) + params["b_rgb"]
    N, H, W, C = h.shape
    G = min(group_size, N)
    M = N // G
    y = h.reshape(M, G, H, W, C)                                 # contiguous groups
    mu = y.mean(axis=1, keepdims=True)
    var = ((y - mu) ** 2).mean(axis=1)
    s = jnp.sqrt(var + 1e-8).mean(axis=(1, 2, 3))                # (M,)
    std_ch = jnp.repeat(s, G).reshape(N, 1, 1, 1) * jnp.ones((N, H, W, 1),
                                                             jnp.float32)
    h = jnp.concatenate([h, std_ch], axis=-1)
    w_c3 = jnp.transpose(params["w_c3"], (2, 3, 1, 0))
    h = lax.conv_general_dilated(h, w_c3, (1, 1), ((1, 1), (1, 1)),
                                 dimension_numbers=dn,
                                 precision=prec) + params["b_c3"]
    h = jnp.where(h >= 0, h, 0.2 * h)
    w_c4 = jnp.transpose(params["w_c4"], (2, 3, 1, 0))
    h = lax.conv_general_dilated(h, w_c4, (1, 1), "VALID",
                                 dimension_numbers=dn,
                                 precision=prec) + params["b_c4"]
    h = jnp.where(h >= 0, h, 0.2 * h)                            # (N,1,1,C)
    h = h.reshape(N, C)
    out = jnp.dot(h, params["w_fc"].T, precision=prec) + params["b_fc"]
    return out.reshape(-1)


if __name__ == "__main__":
    # resl_to_ch is not given in the source; use a small synthetic table.
    resl_to_ch = {4: (16, 16)}      # (in_c, out_c) at resl=4
    N, RGB, H, W = 4, 3, 4, 4       # batch = group_size = 4, resl = 4
    C = resl_to_ch[4][1]

    key = jax.random.PRNGKey(0)
    k_x, k_p = jax.random.split(key)
    x = jax.random.normal(k_x, (N, RGB, H, W), jnp.float32)      # NCHW like PyTorch
    params = make_params(k_p, C=C, rgb=RGB)

    # TODO(synk): NoiseLayer noise injection (x + magnitude*randn) is omitted;
    # at module init magnitude == 0 so it is an exact identity.

    out = d_stabilization_forward(x, params, group_size=4)
    out = jax.block_until_ready(out)

    ref = d_stabilization_forward_ref(x, params, group_size=4)
    assert out.shape == (N,)
    # N > 1, asymmetric random content: covers the roll+mask shift invariant.
    # Tight f32 tolerance (both sides full f32) so layout regressions are caught.
    np.testing.assert_allclose(np.asarray(out), np.asarray(ref),
                               rtol=1e-4, atol=1e-4)
    print("KERNEL_OK")
</pallas_src>

<mosaic_0001>
module attributes {stable_mosaic.version = 11 : i64} {
  func.func @d_group_kernel(%arg0: i32, %arg1: memref<64x3xf32, #tpu.memory_space<vmem>>, %arg2: memref<3x16xf32, #tpu.memory_space<vmem>>, %arg3: memref<1x16xf32, #tpu.memory_space<vmem>>, %arg4: memref<144x16xf32, #tpu.memory_space<vmem>>, %arg5: memref<9x16xf32, #tpu.memory_space<vmem>>, %arg6: memref<1x16xf32, #tpu.memory_space<vmem>>, %arg7: memref<256x16xf32, #tpu.memory_space<vmem>>, %arg8: memref<1x16xf32, #tpu.memory_space<vmem>>, %arg9: memref<1x16xf32, #tpu.memory_space<vmem>>, %arg10: memref<1x1xf32, #tpu.memory_space<vmem>>, %arg11: memref<64x9xf32, #tpu.memory_space<vmem>>, %arg12: memref<64x144xf32, #tpu.memory_space<vmem>>, %arg13: memref<64x256xf32, #tpu.memory_space<vmem>>, %arg14: memref<4x64xf32, #tpu.memory_space<vmem>>, %arg15: memref<1x4xf32, #tpu.memory_space<vmem>>) attributes {dimension_semantics = [#tpu.dimension_semantics<parallel>], iteration_bounds = array<i64: 1>, scalar_prefetch = 0 : i64, scratch_operands = 0 : i64, tpu.core_type = #tpu.core_type<tc>, window_params = [{transform_indices = @transform_0, window_bounds = array<i64: 64, 3>}, {pipeline_mode = #tpu.pipeline_mode<synchronous>, transform_indices = @transform_1, window_bounds = array<i64: 3, 16>}, {pipeline_mode = #tpu.pipeline_mode<synchronous>, transform_indices = @transform_2, window_bounds = array<i64: 1, 16>}, {pipeline_mode = #tpu.pipeline_mode<synchronous>, transform_indices = @transform_3, window_bounds = array<i64: 144, 16>}, {pipeline_mode = #tpu.pipeline_mode<synchronous>, transform_indices = @transform_4, window_bounds = array<i64: 9, 16>}, {pipeline_mode = #tpu.pipeline_mode<synchronous>, transform_indices = @transform_5, window_bounds = array<i64: 1, 16>}, {pipeline_mode = #tpu.pipeline_mode<synchronous>, transform_indices = @transform_6, window_bounds = array<i64: 256, 16>}, {pipeline_mode = #tpu.pipeline_mode<synchronous>, transform_indices = @transform_7, window_bounds = array<i64: 1, 16>}, {pipeline_mode = #tpu.pipeline_mode<synchronous>, transform_indices = @transform_8, window_bounds = array<i64: 1, 16>}, {pipeline_mode = #tpu.pipeline_mode<synchronous>, transform_indices = @transform_9, window_bounds = array<i64: 1, 1>}, {pipeline_mode = #tpu.pipeline_mode<synchronous>, transform_indices = @transform_10, window_bounds = array<i64: 64, 9>}, {pipeline_mode = #tpu.pipeline_mode<synchronous>, transform_indices = @transform_11, window_bounds = array<i64: 64, 144>}, {pipeline_mode = #tpu.pipeline_mode<synchronous>, transform_indices = @transform_12, window_bounds = array<i64: 64, 256>}, {pipeline_mode = #tpu.pipeline_mode<synchronous>, transform_indices = @transform_13, window_bounds = array<i64: 4, 64>}, {transform_indices = @transform_14, window_bounds = array<i64: 1, 4>}]} {
    %c0 = arith.constant 0 : index
    %c0_0 = arith.constant 0 : index
    %0 = vector.load %arg1[%c0, %c0_0] : memref<64x3xf32, #tpu.memory_space<vmem>>, vector<64x3xf32>
    %c0_1 = arith.constant 0 : index
    %c0_2 = arith.constant 0 : index
    %1 = vector.load %arg2[%c0_1, %c0_2] : memref<3x16xf32, #tpu.memory_space<vmem>>, vector<3x16xf32>
    %cst = arith.constant dense<0.000000e+00> : vector<64x16xf32>
    %2 = tpu.matmul %0, %1, %cst {dimension_numbers = #tpu.dot_dimension_numbers<[1], [0], [0], [1], [0, 0, 1, 1], [], []>} : vector<64x3xf32>, vector<3x16xf32>, vector<64x16xf32> -> vector<64x16xf32>
    %c0_3 = arith.constant 0 : index
    %c0_4 = arith.constant 0 : index
    %3 = vector.load %arg3[%c0_3, %c0_4] : memref<1x16xf32, #tpu.memory_space<vmem>>, vector<1x16xf32>
    %4 = vector.broadcast %3 : vector<1x16xf32> to vector<64x16xf32>
    %5 = arith.addf %2, %4 : vector<64x16xf32>
    %6 = vector.extract_strided_slice %5 {offsets = [0, 0], sizes = [16, 16], strides = [1, 1]} : vector<64x16xf32> to vector<16x16xf32>
    %7 = vector.extract_strided_slice %5 {offsets = [16, 0], sizes = [16, 16], strides = [1, 1]} : vector<64x16xf32> to vector<16x16xf32>
    %8 = vector.extract_strided_slice %5 {offsets = [32, 0], sizes = [16, 16], strides = [1, 1]} : vector<64x16xf32> to vector<16x16xf32>
    %9 = vector.extract_strided_slice %5 {offsets = [48, 0], sizes = [16, 16], strides = [1, 1]} : vector<64x16xf32> to vector<16x16xf32>
    %cst_5 = arith.constant 0.000000e+00 : f32
    %10 = vector.broadcast %cst_5 : f32 to vector<16x16xf32>
    %11 = arith.addf %10, %6 : vector<16x16xf32>
    %12 = arith.addf %11, %7 : vector<16x16xf32>
    %13 = arith.addf %12, %8 : vector<16x16xf32>
    %14 = arith.addf %13, %9 : vector<16x16xf32>
    %cst_6 = arith.constant 4.000000e+00 : f32
    %15 = vector.broadcast %cst_6 : f32 to vector<16x16xf32>
    %16 = arith.divf %14, %15 : vector<16x16xf32>
    %17 = arith.subf %6, %16 : vector<16x16xf32>
    %18 = arith.mulf %17, %17 : vector<16x16xf32>
    %19 = arith.subf %7, %16 : vector<16x16xf32>
    %20 = arith.mulf %19, %19 : vector<16x16xf32>
    %21 = arith.subf %8, %16 : vector<16x16xf32>
    %22 = arith.mulf %21, %21 : vector<16x16xf32>
    %23 = arith.subf %9, %16 : vector<16x16xf32>
    %24 = arith.mulf %23, %23 : vector<16x16xf32>
    %cst_7 = arith.constant 0.000000e+00 : f32
    %25 = vector.broadcast %cst_7 : f32 to vector<16x16xf32>
    %26 = arith.addf %25, %18 : vector<16x16xf32>
    %27 = arith.addf %26, %20 : vector<16x16xf32>
    %28 = arith.addf %27, %22 : vector<16x16xf32>
    %29 = arith.addf %28, %24 : vector<16x16xf32>
    %cst_8 = arith.constant 4.000000e+00 : f32
    %30 = vector.broadcast %cst_8 : f32 to vector<16x16xf32>
    %31 = arith.divf %29, %30 : vector<16x16xf32>
    %cst_9 = arith.constant 9.99999993E-9 : f32
    %32 = vector.broadcast %cst_9 : f32 to vector<16x16xf32>
    %33 = arith.addf %31, %32 : vector<16x16xf32>
    %34 = math.sqrt %33 : vector<16x16xf32>
    %35 = vector.shape_cast %34 : vector<16x16xf32> to vector<1x16x16xf32>
    %cst_10 = arith.constant dense<0.000000e+00> : vector<1xf32>
    %36 = vector.multi_reduction <add>, %35, %cst_10 [1, 2] : vector<1x16x16xf32> to vector<1xf32>
    %37 = vector.shape_cast %36 : vector<1xf32> to vector<1x1x1xf32>
    %38 = vector.extract %37[0, 0, 0] : f32 from vector<1x1x1xf32>
    %cst_11 = arith.constant 2.560000e+02 : f32
    %39 = arith.divf %38, %cst_11 : f32
    %c5_i32 = arith.constant 5 : i32
    %40 = tpu.dynamic_rotate %5 by %c5_i32 dim 0 : vector<64x16xf32>, i32 -> vector<64x16xf32>
    %c4_i32 = arith.constant 4 : i32
    %41 = tpu.dynamic_rotate %5 by %c4_i32 dim 0 : vector<64x16xf32>, i32 -> vector<64x16xf32>
    %c3_i32 = arith.constant 3 : i32
    %42 = tpu.dynamic_rotate %5 by %c3_i32 dim 0 : vector<64x16xf32>, i32 -> vector<64x16xf32>
    %c1_i32 = arith.constant 1 : i32
    %43 = tpu.dynamic_rotate %5 by %c1_i32 dim 0 : vector<64x16xf32>, i32 -> vector<64x16xf32>
    %c63_i32 = arith.constant 63 : i32
    %44 = tpu.dynamic_rotate %5 by %c63_i32 dim 0 : vector<64x16xf32>, i32 -> vector<64x16xf32>
    %c61_i32 = arith.constant 61 : i32
    %45 = tpu.dynamic_rotate %5 by %c61_i32 dim 0 : vector<64x16xf32>, i32 -> vector<64x16xf32>
    %c60_i32 = arith.constant 60 : i32
    %46 = tpu.dynamic_rotate %5 by %c60_i32 dim 0 : vector<64x16xf32>, i32 -> vector<64x16xf32>
    %c59_i32 = arith.constant 59 : i32
    %47 = tpu.dynamic_rotate %5 by %c59_i32 dim 0 : vector<64x16xf32>, i32 -> vector<64x16xf32>
    %48 = tpu.concatenate %40, %41, %42, %43, %5, %44, %45, %46, %47 in 1 : vector<64x16xf32>, vector<64x16xf32>, vector<64x16xf32>, vector<64x16xf32>, vector<64x16xf32>, vector<64x16xf32>, vector<64x16xf32>, vector<64x16xf32>, vector<64x16xf32> -> vector<64x144xf32>
    %c0_12 = arith.constant 0 : index
    %c0_13 = arith.constant 0 : index
    %49 = vector.load %arg12[%c0_12, %c0_13] : memref<64x144xf32, #tpu.memory_space<vmem>>, vector<64x144xf32>
    %50 = arith.mulf %48, %49 : vector<64x144xf32>
    %c0_14 = arith.constant 0 : index
    %c0_15 = arith.constant 0 : index
    %51 = vector.load %arg4[%c0_14, %c0_15] : memref<144x16xf32, #tpu.memory_space<vmem>>, vector<144x16xf32>
    %cst_16 = arith.constant dense<0.000000e+00> : vector<64x16xf32>
    %52 = tpu.matmul %50, %51, %cst_16 {dimension_numbers = #tpu.dot_dimension_numbers<[1], [0], [0], [1], [0, 0, 1, 1], [], []>} : vector<64x144xf32>, vector<144x16xf32>, vector<64x16xf32> -> vector<64x16xf32>
    %c0_17 = arith.constant 0 : index
    %c0_18 = arith.constant 0 : index
    %53 = vector.load %arg11[%c0_17, %c0_18] : memref<64x9xf32, #tpu.memory_space<vmem>>, vector<64x9xf32>
    %c0_19 = arith.constant 0 : index
    %c0_20 = arith.constant 0 : index
    %54 = vector.load %arg5[%c0_19, %c0_20] : memref<9x16xf32, #tpu.memory_space<vmem>>, vector<9x16xf32>
    %cst_21 = arith.constant dense<0.000000e+00> : vector<64x16xf32>
    %55 = tpu.matmul %53, %54, %cst_21 {dimension_numbers = #tpu.dot_dimension_numbers<[1], [0], [0], [1], [0, 0, 1, 1], [], []>} : vector<64x9xf32>, vector<9x16xf32>, vector<64x16xf32> -> vector<64x16xf32>
    %56 = vector.broadcast %39 : f32 to vector<64x16xf32>
    %57 = arith.mulf %56, %55 : vector<64x16xf32>
    %58 = arith.addf %52, %57 : vector<64x16xf32>
    %c0_22 = arith.constant 0 : index
    %c0_23 = arith.constant 0 : index
    %59 = vector.load %arg6[%c0_22, %c0_23] : memref<1x16xf32, #tpu.memory_space<vmem>>, vector<1x16xf32>
    %60 = vector.broadcast %59 : vector<1x16xf32> to vector<64x16xf32>
    %61 = arith.addf %58, %60 : vector<64x16xf32>
    %cst_24 = arith.constant 0.000000e+00 : f32
    %62 = vector.broadcast %cst_24 : f32 to vector<64x16xf32>
    %63 = arith.cmpf oge, %61, %62 : vector<64x16xf32>
    %cst_25 = arith.constant 2.000000e-01 : f32
    %64 = vector.broadcast %cst_25 : f32 to vector<64x16xf32>
    %65 = arith.mulf %64, %61 : vector<64x16xf32>
    %66 = arith.select %63, %61, %65 : vector<64x16xi1>, vector<64x16xf32>
    %67 = tpu.concatenate %66, %66, %66, %66, %66, %66, %66, %66, %66, %66, %66, %66, %66, %66, %66, %66 in 1 : vector<64x16xf32>, vector<64x16xf32>, vector<64x16xf32>, vector<64x16xf32>, vector<64x16xf32>, vector<64x16xf32>, vector<64x16xf32>, vector<64x16xf32>, vector<64x16xf32>, vector<64x16xf32>, vector<64x16xf32>, vector<64x16xf32>, vector<64x16xf32>, vector<64x16xf32>, vector<64x16xf32>, vector<64x16xf32> -> vector<64x256xf32>
    %c0_26 = arith.constant 0 : index
    %c0_27 = arith.constant 0 : index
    %68 = vector.load %arg13[%c0_26, %c0_27] : memref<64x256xf32, #tpu.memory_space<vmem>>, vector<64x256xf32>
    %69 = arith.mulf %67, %68 : vector<64x256xf32>
    %c0_28 = arith.constant 0 : index
    %c0_29 = arith.constant 0 : index
    %70 = vector.load %arg7[%c0_28, %c0_29] : memref<256x16xf32, #tpu.memory_space<vmem>>, vector<256x16xf32>
    %cst_30 = arith.constant dense<0.000000e+00> : vector<64x16xf32>
    %71 = tpu.matmul %69, %70, %cst_30 {dimension_numbers = #tpu.dot_dimension_numbers<[1], [0], [0], [1], [0, 0, 1, 1], [], []>} : vector<64x256xf32>, vector<256x16xf32>, vector<64x16xf32> -> vector<64x16xf32>
    %c0_31 = arith.constant 0 : index
    %c0_32 = arith.constant 0 : index
    %72 = vector.load %arg14[%c0_31, %c0_32] : memref<4x64xf32, #tpu.memory_space<vmem>>, vector<4x64xf32>
    %cst_33 = arith.constant dense<0.000000e+00> : vector<4x16xf32>
    %73 = tpu.matmul %72, %71, %cst_33 {dimension_numbers = #tpu.dot_dimension_numbers<[1], [0], [0], [1], [0, 0, 1, 1], [], []>} : vector<4x64xf32>, vector<64x16xf32>, vector<4x16xf32> -> vector<4x16xf32>
    %c0_34 = arith.constant 0 : index
    %c0_35 = arith.constant 0 : index
    %74 = vector.load %arg8[%c0_34, %c0_35] : memref<1x16xf32, #tpu.memory_space<vmem>>, vector<1x16xf32>
    %75 = vector.broadcast %74 : vector<1x16xf32> to vector<4x16xf32>
    %76 = arith.addf %73, %75 : vector<4x16xf32>
    %cst_36 = arith.constant 0.000000e+00 : f32
    %77 = vector.broadcast %cst_36 : f32 to vector<4x16xf32>
    %78 = arith.cmpf oge, %76, %77 : vector<4x16xf32>
    %cst_37 = arith.constant 2.000000e-01 : f32
    %79 = vector.broadcast %cst_37 : f32 to vector<4x16xf32>
    %80 = arith.mulf %79, %76 : vector<4x16xf32>
    %81 = arith.select %78, %76, %80 : vector<4x16xi1>, vector<4x16xf32>
    %c0_38 = arith.constant 0 : index
    %c0_39 = arith.constant 0 : index
    %82 = vector.load %arg9[%c0_38, %c0_39] : memref<1x16xf32, #tpu.memory_space<vmem>>, vector<1x16xf32>
    "tpu.trace_start"() <{level = 10 : i32, message = "oc,gc->og"}> : () -> ()
    %cst_40 = arith.constant dense<0.000000e+00> : vector<1x4xf32>
    %83 = tpu.matmul %82, %81, %cst_40 {dimension_numbers = #tpu.dot_dimension_numbers<[1], [1], [0], [0], [0, 0, 1, 0], [], []>} : vector<1x16xf32>, vector<4x16xf32>, vector<1x4xf32> -> vector<1x4xf32>
    "tpu.trace_stop"() : () -> ()
    %c0_41 = arith.constant 0 : index
    %c0_42 = arith.constant 0 : index
    %84 = vector.load %arg10[%c0_41, %c0_42] : memref<1x1xf32, #tpu.memory_space<vmem>>, vector<1x1xf32>
    %85 = vector.broadcast %84 : vector<1x1xf32> to vector<1x4xf32>
    %86 = arith.addf %83, %85 : vector<1x4xf32>
    %c0_43 = arith.constant 0 : index
    %c0_44 = arith.constant 0 : index
    %87 = vector.load %arg15[%c0_43, %c0_44] : memref<1x4xf32, #tpu.memory_space<vmem>>, vector<1x4xf32>
    tpu.vector_store %arg15[%c0_43, %c0_44], %86 {strides = array<i32>} : memref<1x4xf32, #tpu.memory_space<vmem>>, vector<1x4xf32>,
    return
  }
  func.func @transform_0(%arg0: i32) -> (i32, i32) {
    %c0_i32 = arith.constant 0 : i32
    %c0_i32_0 = arith.constant 0 : i32
    return %arg0, %c0_i32 : i32, i32
  }
  func.func @transform_1(%arg0: i32) -> (i32, i32) {
    %c0_i32 = arith.constant 0 : i32
    %c0_i32_0 = arith.constant 0 : i32
    %c0_i32_1 = arith.constant 0 : i32
    return %c0_i32, %c0_i32_0 : i32, i32
  }
  func.func @transform_2(%arg0: i32) -> (i32, i32) {
    %c0_i32 = arith.constant 0 : i32
    %c0_i32_0 = arith.constant 0 : i32
    %c0_i32_1 = arith.constant 0 : i32
    return %c0_i32, %c0_i32_0 : i32, i32
  }
  func.func @transform_3(%arg0: i32) -> (i32, i32) {
    %c0_i32 = arith.constant 0 : i32
    %c0_i32_0 = arith.constant 0 : i32
    %c0_i32_1 = arith.constant 0 : i32
    return %c0_i32, %c0_i32_0 : i32, i32
  }
  func.func @transform_4(%arg0: i32) -> (i32, i32) {
    %c0_i32 = arith.constant 0 : i32
    %c0_i32_0 = arith.constant 0 : i32
    %c0_i32_1 = arith.constant 0 : i32
    return %c0_i32, %c0_i32_0 : i32, i32
  }
  func.func @transform_5(%arg0: i32) -> (i32, i32) {
    %c0_i32 = arith.constant 0 : i32
    %c0_i32_0 = arith.constant 0 : i32
    %c0_i32_1 = arith.constant 0 : i32
    return %c0_i32, %c0_i32_0 : i32, i32
  }
  func.func @transform_6(%arg0: i32) -> (i32, i32) {
    %c0_i32 = arith.constant 0 : i32
    %c0_i32_0 = arith.constant 0 : i32
    %c0_i32_1 = arith.constant 0 : i32
    return %c0_i32, %c0_i32_0 : i32, i32
  }
  func.func @transform_7(%arg0: i32) -> (i32, i32) {
    %c0_i32 = arith.constant 0 : i32
    %c0_i32_0 = arith.constant 0 : i32
    %c0_i32_1 = arith.constant 0 : i32
    return %c0_i32, %c0_i32_0 : i32, i32
  }
  func.func @transform_8(%arg0: i32) -> (i32, i32) {
    %c0_i32 = arith.constant 0 : i32
    %c0_i32_0 = arith.constant 0 : i32
    %c0_i32_1 = arith.constant 0 : i32
    return %c0_i32, %c0_i32_0 : i32, i32
  }
  func.func @transform_9(%arg0: i32) -> (i32, i32) {
    %c0_i32 = arith.constant 0 : i32
    %c0_i32_0 = arith.constant 0 : i32
    %c0_i32_1 = arith.constant 0 : i32
    return %c0_i32, %c0_i32_0 : i32, i32
  }
  func.func @transform_10(%arg0: i32) -> (i32, i32) {
    %c0_i32 = arith.constant 0 : i32
    %c0_i32_0 = arith.constant 0 : i32
    %c0_i32_1 = arith.constant 0 : i32
    return %c0_i32, %c0_i32_0 : i32, i32
  }
  func.func @transform_11(%arg0: i32) -> (i32, i32) {
    %c0_i32 = arith.constant 0 : i32
    %c0_i32_0 = arith.constant 0 : i32
    %c0_i32_1 = arith.constant 0 : i32
    return %c0_i32, %c0_i32_0 : i32, i32
  }
  func.func @transform_12(%arg0: i32) -> (i32, i32) {
    %c0_i32 = arith.constant 0 : i32
    %c0_i32_0 = arith.constant 0 : i32
    %c0_i32_1 = arith.constant 0 : i32
    return %c0_i32, %c0_i32_0 : i32, i32
  }
  func.func @transform_13(%arg0: i32) -> (i32, i32) {
    %c0_i32 = arith.constant 0 : i32
    %c0_i32_0 = arith.constant 0 : i32
    %c0_i32_1 = arith.constant 0 : i32
    return %c0_i32, %c0_i32_0 : i32, i32
  }
  func.func @transform_14(%arg0: i32) -> (i32, i32) {
    %c0_i32 = arith.constant 0 : i32
    %c0_i32_0 = arith.constant 0 : i32
    return %arg0, %c0_i32 : i32, i32
  }
}

</mosaic_0001>

<bundles_post_ra>
// kernel: tpu_custom_call.1
= control target key start
LH: loop header
LB: loop body
LE: loop exit
PB: predicated region body
PF: predicated region fallthrough
CT: control target
= control target key end

     0   :  { %s3079_s0 = inlined_call_operand.vmem [shape: f32[64,3], index: 0, kind: input, shape index: {}]   ;;  %s3080_s1 = inlined_call_operand.vmem [shape: f32[3,16], index: 1, kind: input, shape index: {}]   ;;  %s3081_s2 = inlined_call_operand.vmem [shape: f32[1,16], index: 2, kind: input, shape index: {}]   ;;  %s3082_s3 = inlined_call_operand.vmem [shape: f32[144,16], index: 3, kind: input, shape index: {}]   ;;  %s3083_s4 = inlined_call_operand.vmem [shape: f32[9,16], index: 4, kind: input, shape index: {}]   ;;  %s3084_s5 = inlined_call_operand.vmem [shape: f32[1,16], index: 5, kind: input, shape index: {}]   ;;  %s3085_s6 = inlined_call_operand.vmem [shape: f32[256,16], index: 6, kind: input, shape index: {}]   ;;  %s3086_s7 = inlined_call_operand.vmem [shape: f32[1,16], index: 7, kind: input, shape index: {}]   ;;  %s3087_s8 = inlined_call_operand.vmem [shape: f32[1,16], index: 8, kind: input, shape index: {}]   ;;  %s3088_s9 = inlined_call_operand.<no memory space> [shape: f32[1,1], index: 9, kind: input, shape index: {}]   ;;  %s3089_s10 = inlined_call_operand.vmem [shape: f32[64,9], index: 10, kind: input, shape index: {}]   ;;  %s3090_s11 = inlined_call_operand.vmem [shape: f32[64,144], index: 11, kind: input, shape index: {}]   ;;  %s3091_s12 = inlined_call_operand.vmem [shape: f32[64,256], index: 12, kind: input, shape index: {}]   ;;  %s3092_s13 = inlined_call_operand.vmem [shape: f32[4,64], index: 13, kind: input, shape index: {}]   ;;  %s3093_s14 = inlined_call_operand.hbm [shape: f32[1,4], index: 14, kind: output, shape index: {}]  }
   0x1   :  { %v19_v0 = vstv %s3088_s9 }
   0x2   :  { %20 = vst [vmem:[#allocation2] sm:$0x1] %v19_v0 }
   0x3   :  { %v58_v1 = vld [vmem:[%s3080_s1] sm:$0x7]  ;;  %vm91_vm0 = vcmask 1042432   ;;  %vm66_vm1 = vcmask 23552   ;;  %v51_v3 = vld [vmem:[%s3079_s0 + $0x8] sm:$0xff]  ;;  %v52_v4 = vld [vmem:[%s3079_s0 + $0x10] sm:$0xff] }
   0x4   :  { %v50_v2 = vld [vmem:[%s3079_s0] sm:$0xff]  ;;  %1711 = vmatprep.subr.msk.mxu0 %vm91_vm0, %v58_v1 }
   0x5   :  { %1713 = vmatprep.mubr.msk.f32.mxu0 %vm66_vm1, %v50_v2  ;;  %1712 = vmatpush3.msk.msra.mxu0 %vm91_vm0, %v58_v1 }
   0x6   :  { %1714 = vmatmul.mubr.msk.f32.vlgmr.msra.gmra.mrb[0].mxu0 %vm66_vm1, %v51_v3 }
   0x7   :  { %21 = vsyncpa [#allocation4], 0  ;;  %1716 = vmatprep.mubr.msk.f32.mxu0 %vm66_vm1, %v52_v4  ;;  %v53_v5 = vld [vmem:[%s3079_s0 + $0x18] sm:$0xff]  ;;  %v54_v6 = vld [vmem:[%s3079_s0 + $0x20] sm:$0xff]  ;;  %vm719_vm2 = vcmask 1040384   ;;  %vm1887_vm3 = vmmov 1   ;;  %v277_v13 = vlaneseq }
   0x8   :  { %v55_v7 = vld [vmem:[%s3079_s0 + $0x28] sm:$0xff]  ;;  %v56_v8 = vld [vmem:[%s3079_s0 + $0x30] sm:$0xff]  ;;  %v57_v9 = vld [vmem:[%s3079_s0 + $0x38] sm:$0xff]  ;;  %vm694_vm5 = vcmask 72704   ;;  %s1888_s28 = smov 64   ;;  %vm253_vm11 = vcmask 130048  }
   0x9   :  { %v692_v10 = vld [vmem:[%s3083_s4] sm:$0xff]  ;;  %v693_v11 = vld [vmem:[%s3083_s4 + $0x8] sm:$0x1]  ;;  %vm1766_vm4 = vmpackc.low %vm719_vm2, %vm1887_vm3  ;;  %v2026_v16 = vshrl.u32 %v277_v13, 7  ;;  %s1889_s19 = smov 16   ;;  %s1891_s20 = smov 32  }
   0xa   :  { %1717 = vmatmul.mubr.msk.f32.gmra.mrb[2].mxu0 %vm66_vm1, %v53_v5  ;;  %v1765_v12 = vpack.c.bf16 %v693_v11, %v692_v10  ;;  %v684_v14 = vld [vmem:[%s3089_s10] sm:$0xff]  ;;  %v685_v15 = vld [vmem:[%s3089_s10 + $0x8] sm:$0xff]  ;;  %v686_v18 = vld [vmem:[%s3089_s10 + $0x10] sm:$0xff]  ;;  %s1892_s0 = smov 96   ;;  %s1893_s21 = smov 48   ;;  %vm580_vm0 = vcmask 261120  }
   0xb   :  { %1719 = vmatprep.mubr.msk.f32.mxu0 %vm66_vm1, %v54_v6  ;;  %1729 = vmatprep.mubr.msk.f32.mxu1 %vm694_vm5, %v684_v14  ;;  %v2032_v17 = vld [vmem:[%s3081_s2] ss:$0 sm:$0xff]  ;;  %v687_v19 = vld [vmem:[%s3089_s10 + $0x18] sm:$0xff]  ;;  %vm296_vm6 = vcmp.lt.s32.totalorder %v2026_v16, 4  ;;  %vm347_vm7 = vcmp.lt.s32.totalorder %v2026_v16, 7  ;;  %vm313_vm8 = vcmp.lt.s32.totalorder %v2026_v16, 3 }
   0xc   :  { %1767 = vmatprep.subr.msk.bf16.mxu1 %vm1766_vm4, %v1765_v12  ;;  %vm279_vm9 = vcmp.lt.s32.totalorder %v2026_v16, 5  ;;  %vm330_vm10 = vcmp.lt.s32.totalorder %v2026_v16, 1  ;;  %v688_v24 = vld [vmem:[%s3089_s10 + $0x20] sm:$0xff]  ;;  %v689_v25 = vld [vmem:[%s3089_s10 + $0x28] sm:$0xff]  ;;  %v690_v44 = vld [vmem:[%s3089_s10 + $0x30] sm:$0xff]  ;;  %s1894_s4 = smov 112  }
   0xd   :  { %1770 = vmatpush3.bf16.msk.msra.mxu1 %vm1766_vm4, %v1765_v12  ;;  %v635_v34 = vld [vmem:[%s3090_s11 + $0x8] sm:$0xff]  ;;  %v691_v45 = vld [vmem:[%s3089_s10 + $0x38] sm:$0xff]  ;;  %s1890_s10 = smov 80   ;;  %vm598_vm2 = vcmask 523264   ;;  %vm607_vm3 = vcmask 654336   ;;  %vm616_vm4 = vcmask 785408  }
   0xe   :  { %1720 = vmatmul.mubr.msk.f32.gmra.mrb[4].mxu0 %vm66_vm1, %v55_v7  ;;  %s1899_s23 = smov [#allocation3]  }
   0xf   :  { %1722 = vmatprep.mubr.msk.f32.mxu0 %vm66_vm1, %v56_v8 }
  0x10   :  { %1730 = vmatmul.mubr.msk.f32.vlgmr.msra.gmra.mrb[0].mxu1 %vm694_vm5, %v685_v15 }
  0x11   :  { %1732 = vmatprep.mubr.msk.f32.mxu1 %vm694_vm5, %v686_v18 }
  0x12   :  { %1723 = vmatmul.mubr.msk.f32.gmra.mrb[6].mxu0 %vm66_vm1, %v57_v9  ;;  %vm589_vm1 = vcmask 392192  }
  0x14   :  { %1733 = vmatmul.mubr.msk.f32.gmra.mrb[2].mxu1 %vm694_vm5, %v687_v19 }
  0x15   :  { %1735 = vmatprep.mubr.msk.f32.mxu1 %vm694_vm5, %v688_v24 }
  0x18   :  { %1736 = vmatmul.mubr.msk.f32.gmra.mrb[4].mxu1 %vm694_vm5, %v689_v25 }
  0x19   :  { %1738 = vmatprep.mubr.msk.f32.mxu1 %vm694_vm5, %v690_v44 }
  0x1c   :  { %1739 = vmatmul.mubr.msk.f32.gmra.mrb[6].mxu1 %vm694_vm5, %v691_v45  ;;  %vm625_vm5 = vcmask 916480  }
  0xd9   :  { %v1715_v20 = vpop.f32.mrb[0].mxu0 }
  0xda   :  { %v2042_v21 = vadd.f32 %v1715_v20, %v2032_v17  ;;  %v161_v22 = vpop.f32.mrb[1].mxu0 }
  0xdb   :  { %v2048_v23 = vadd.f32 %v2032_v17, %v161_v22 }
  0xdc   :  { %462 = vrot.lane.b32.xlu0 %v2042_v21, %s1888_s28  ;;  %v289_v26 = vrot.slane %v2042_v21, 4  ;;  %v340_v27 = vrot.slane %v2042_v21, 1  ;;  %v306_v28 = vrot.slane %v2042_v21, 5  ;;  %v270_v29 = vrot.slane %v2042_v21, 3 }
  0xdd   :  { %v1718_v30 = vpop.f32.mrb[2].mxu0  ;;  %460 = vrot.lane.b32.xlu1 %v2048_v23, %s1888_s28  ;;  %v288_v31 = vrot.slane %v2048_v23, 4  ;;  %v339_v32 = vrot.slane %v2048_v23, 1  ;;  %v305_v33 = vrot.slane %v2048_v23, 5  ;;  %v269_v35 = vrot.slane %v2048_v23, 3 }
  0xde   :  { %v2076_v36 = vadd.f32 %v1718_v30, %v2032_v17  ;;  %v171_v37 = vpop.f32.mrb[3].mxu0  ;;  %v322_v38 = vrot.slane %v2048_v23, 7  ;;  %v323_v39 = vrot.slane %v2042_v21, 7 }
  0xdf   :  { %v2082_v40 = vadd.f32 %v2032_v17, %v171_v37  ;;  %v303_v41 = vsel %vm296_vm6, %v288_v31, %v289_v26  ;;  %v354_v42 = vsel %vm347_vm7, %v339_v32, %v340_v27  ;;  %v320_v43 = vsel %vm313_vm8, %v305_v33, %v306_v28 }
  0xe0   :  { %v203_v46 = vadd.f32 %v2076_v36, %v2042_v21  ;;  %366 = vrot.lane.b32.xlu0 %v303_v41, %s1889_s19  ;;  %v651_v47 = vmul.f32 %v635_v34, %v320_v43  ;;  %v2109_v48 = vsel %vm279_vm9, %v269_v35, %v270_v29  ;;  %v337_v49 = vsel %vm330_vm10, %v322_v38, %v323_v39 }
  0xe1   :  { %v202_v50 = vadd.f32 %v2082_v40, %v2048_v23  ;;  %v1721_v51 = vpop.f32.mrb[4].mxu0  ;;  %492 = vrot.lane.b32.xlu1 %v354_v42, %s1890_s10  ;;  %v341_v52 = vrot.slane %v2082_v40, 1  ;;  %v290_v53 = vrot.slane %v2082_v40, 4  ;;  %v271_v54 = vrot.slane %v2082_v40, 3 }
  0xe2   :  { %v2123_v55 = vadd.f32 %v1721_v51, %v2032_v17  ;;  %v181_v56 = vpop.f32.mrb[5].mxu0  ;;  %1612 = vmatprep.mubr.msk.f32.mxu0 %vm253_vm11, %v651_v47  ;;  %v307_v57 = vrot.slane %v2082_v40, 5  ;;  %v324_v58 = vrot.slane %v2082_v40, 7  ;;  %v291_v59 = vrot.slane %v2076_v36, 4 }
  0xe3   :  { %v2131_v60 = vadd.f32 %v2032_v17, %v181_v56  ;;  %v353_v61 = vsel %vm347_vm7, %v340_v27, %v341_v52  ;;  %v2137_v62 = vsel %vm296_vm6, %v289_v26, %v290_v53  ;;  %v2141_v63 = vsel %vm279_vm9, %v270_v29, %v271_v54 }
  0xe4   :  { %v205_v0 = vadd.f32 %v203_v46, %v2123_v55  ;;  %398 = vrot.lane.b32.xlu0 %v320_v43, %s1891_s20  ;;  %v2147_v1 = vsel %vm313_vm8, %v306_v28, %v307_v57  ;;  %v2151_v2 = vsel %vm330_vm10, %v323_v39, %v324_v58  ;;  %v2155_v3 = vsel %vm296_vm6, %v290_v53, %v291_v59 }
  0xe5   :  { %v204_v4 = vadd.f32 %v202_v50, %v2131_v60  ;;  %v1724_v5 = vpop.f32.mrb[6].mxu0  ;;  %524 = vrot.lane.b32.xlu1 %v2109_v48, %s1892_s0  ;;  %v342_v6 = vrot.slane %v2076_v36, 1  ;;  %v308_v7 = vrot.slane %v2076_v36, 5  ;;  %v272_v10 = vrot.slane %v2076_v36, 3 }
  0xe6   :  { %v2163_v8 = vadd.f32 %v1724_v5, %v2032_v17  ;;  %v191_v9 = vpop.f32.mrb[7].mxu0  ;;  %v325_v11 = vrot.slane %v2076_v36, 7  ;;  %v343_v12 = vrot.slane %v2131_v60, 1  ;;  %v292_v18 = vrot.slane %v2131_v60, 4 }
  0xe7   :  { %v2169_v13 = vadd.f32 %v2032_v17, %v191_v9  ;;  %v2173_v14 = vsel %vm347_vm7, %v341_v52, %v342_v6  ;;  %v2177_v15 = vsel %vm313_vm8, %v307_v57, %v308_v7  ;;  %v2184_v20 = vsel %vm279_vm9, %v271_v54, %v272_v10 }
  0xe8   :  { %v207_v19 = vadd.f32 %v205_v0, %v2163_v8  ;;  %430 = vrot.lane.b32.xlu0 %v337_v49, %s1893_s21  ;;  %v2188_v17 = vsel %vm330_vm10, %v324_v58, %v325_v11  ;;  %v2194_v24 = vsel %vm347_vm7, %v342_v6, %v343_v12  ;;  %v2198_v25 = vsel %vm296_vm6, %v291_v59, %v292_v18 }
  0xe9   :  { %v206_v22 = vadd.f32 %v204_v4, %v2169_v13  ;;  %548 = vrot.lane.b32.xlu1 %v303_v41, %s1894_s4  ;;  %v273_v26 = vrot.slane %v2131_v60, 3  ;;  %v309_v27 = vrot.slane %v2131_v60, 5  ;;  %v326_v28 = vrot.slane %v2131_v60, 7 }
  0xea   :  { %v293_v29 = vrot.slane %v2123_v55, 4  ;;  %v344_v34 = vrot.slane %v2123_v55, 1  ;;  %v310_v37 = vrot.slane %v2123_v55, 5  ;;  %v274_v43 = vrot.slane %v2123_v55, 3 }
  0xeb   :  { %v2206_v30 = vsel %vm279_vm9, %v272_v10, %v273_v26  ;;  %v2214_v39 = vsel %vm313_vm8, %v308_v7, %v309_v27  ;;  %v2218_v41 = vsel %vm330_vm10, %v325_v11, %v326_v28  ;;  %v327_v46 = vrot.slane %v2123_v55, 7 }
  0xec   :  { %466 = vrot.lane.b32.xlu0 %v2076_v36, %s1888_s28  ;;  %v2222_v42 = vsel %vm296_vm6, %v292_v18, %v293_v29  ;;  %v2229_v44 = vsel %vm347_vm7, %v343_v12, %v344_v34  ;;  %v2233_v45 = vsel %vm313_vm8, %v309_v27, %v310_v37  ;;  %v210_v47 = vmul.f32 0.25, %v207_v19 }
  0xed   :  { %464 = vrot.lane.b32.xlu1 %v2082_v40, %s1888_s28  ;;  %v2238_v49 = vsel %vm279_vm9, %v273_v26, %v274_v43  ;;  %v295_v50 = vrot.slane %v2163_v8, 4  ;;  %v312_v51 = vrot.slane %v2163_v8, 5  ;;  %v2244_v52 = vsel %vm330_vm10, %v326_v28, %v327_v46 }
  0xee   :  { %v329_v53 = vrot.slane %v2163_v8, 7  ;;  %v346_v54 = vrot.slane %v2163_v8, 1  ;;  %v345_v56 = vrot.slane %v2169_v13, 1  ;;  %v294_v59 = vrot.slane %v2169_v13, 4 }
  0xef   :  { %v2254_v57 = vsel %vm296_vm6, %v295_v50, %v288_v31  ;;  %v2260_v58 = vsel %vm313_vm8, %v312_v51, %v305_v33  ;;  %v275_v0 = vrot.slane %v2169_v13, 3  ;;  %v209_v4 = vmul.f32 0.25, %v206_v22 }
  0xf0   :  { %494 = vrot.lane.b32.xlu0 %v353_v61, %s1890_s10  ;;  %v2270_v31 = vsel %vm330_vm10, %v329_v53, %v322_v38  ;;  %v2276_v33 = vsel %vm347_vm7, %v346_v54, %v339_v32  ;;  %v2280_v61 = vsel %vm347_vm7, %v344_v34, %v345_v56  ;;  %v2284_v5 = vsel %vm296_vm6, %v293_v29, %v294_v59 }
  0xf1   :  { %368 = vrot.lane.b32.xlu1 %v2137_v62, %s1889_s19  ;;  %v2288_v6 = vsel %vm279_vm9, %v274_v43, %v275_v0  ;;  %v311_v38 = vrot.slane %v2169_v13, 5  ;;  %v328_v7 = vrot.slane %v2169_v13, 7  ;;  %v2294_v32 = vsel %vm296_vm6, %v294_v59, %v295_v50 }
  0xf2   :  { %v2298_v9 = vsel %vm347_vm7, %v345_v56, %v346_v54  ;;  %v276_v10 = vrot.slane %v2163_v8, 3  ;;  %v211_v27 = vsub.f32 %v2048_v23, %v209_v4  ;;  %v212_v28 = vsub.f32 %v2042_v21, %v210_v47 }
  0xf3   :  { %v2305_v11 = vsel %vm313_vm8, %v310_v37, %v311_v38  ;;  %v2309_v12 = vsel %vm330_vm10, %v327_v46, %v328_v7  ;;  %v2313_v18 = vsel %vm313_vm8, %v311_v38, %v312_v51  ;;  %v2317_v19 = vsel %vm330_vm10, %v328_v7, %v329_v53  ;;  %v666_v38 = vld [vmem:[%s3082_s3] sm:$0xff] }
  0xf4   :  { %526 = vrot.lane.b32.xlu0 %v2141_v63, %s1892_s0  ;;  %v2323_v22 = vsel %vm279_vm9, %v275_v0, %v276_v10  ;;  %v2329_v26 = vsel %vm279_vm9, %v276_v10, %v269_v35  ;;  %v215_v29 = vsub.f32 %v2082_v40, %v209_v4  ;;  %v216_v34 = vsub.f32 %v2076_v36, %v210_v47 }
  0xf5   :  { %400 = vrot.lane.b32.xlu1 %v2147_v1, %s1891_s20  ;;  %v219_v37 = vsub.f32 %v2131_v60, %v209_v4  ;;  %v220_v43 = vsub.f32 %v2123_v55, %v210_v47  ;;  %v213_v46 = vmul.f32 %v211_v27, %v211_v27  ;;  %v214_v50 = vmul.f32 %v212_v28, %v212_v28 }
  0xf6   :  { %v223_v35 = vsub.f32 %v2169_v13, %v209_v4  ;;  %v224_v51 = vsub.f32 %v2163_v8, %v210_v47  ;;  %v217_v21 = vmul.f32 %v215_v29, %v215_v29  ;;  %v218_v23 = vmul.f32 %v216_v34, %v216_v34  ;;  %v668_v34 = vld [vmem:[%s3082_s3 + $0x10] sm:$0xff] }
  0xf7   :  { %v221_v40 = vmul.f32 %v219_v37, %v219_v37  ;;  %v222_v36 = vmul.f32 %v220_v43, %v220_v43  ;;  %v669_v37 = vld [vmem:[%s3082_s3 + $0x18] sm:$0xff] }
  0xf8   :  { %550 = vrot.lane.b32.xlu0 %v2137_v62, %s1894_s4  ;;  %v229_v53 = vadd.f32 %v217_v21, %v213_v46  ;;  %v230_v54 = vadd.f32 %v218_v23, %v214_v50  ;;  %v225_v62 = vmul.f32 %v223_v35, %v223_v35  ;;  %v226_v56 = vmul.f32 %v224_v51, %v224_v51  ;;  %v671_v46 = vld [vmem:[%s3082_s3 + $0x28] sm:$0xff]  ;;  %v674_v21 = vld [vmem:[%s3082_s3 + $0x40] sm:$0xff] }
  0xf9   :  { %432 = vrot.lane.b32.xlu1 %v2151_v2, %s1893_s21  ;;  %v1895_v2 = vmov 0.0|0.0   ;;  %v1775_v43 = vpack.c.bf16 %v669_v37, %v668_v34  ;;  %v675_v23 = vld [vmem:[%s3082_s3 + $0x48] sm:$0xff] }
  0xfa   :  { %v231_v59 = vadd.f32 %v229_v53, %v221_v40  ;;  %v232_v0 = vadd.f32 %v230_v54, %v222_v36  ;;  %1771 = vmatprep.subr.bf16.mxu0 %v1895_v2  ;;  %v1784_v53 = vpack.c.bf16 %v675_v23, %v674_v21 }
  0xfc   :  { %370 = vrot.lane.b32.xlu0 %v2155_v3, %s1889_s19  ;;  %v233_v47 = vadd.f32 %v231_v59, %v225_v62  ;;  %v234_v4 = vadd.f32 %v232_v0, %v226_v56 }
  0xfd   :  { %496 = vrot.lane.b32.xlu1 %v2173_v14, %s1890_s10  ;;  %v667_v14 = vld [vmem:[%s3082_s3 + $0x8] sm:$0xff] }
  0xfe   :  { %v235_v7 = vmul.f32 0.25, %v233_v47  ;;  %v236_v10 = vmul.f32 0.25, %v234_v4  ;;  %v1772_v27 = vpack.c.bf16 %v667_v14, %v666_v38  ;;  %v676_v38 = vld [vmem:[%s3082_s3 + $0x50] sm:$0xff]  ;;  %v677_v14 = vld [vmem:[%s3082_s3 + $0x58] sm:$0xff] }
 0x100   :  { %402 = vrot.lane.b32.xlu0 %v2177_v15, %s1891_s20  ;;  %v237_v28 = vadd.f32 1e-08, %v235_v7  ;;  %v238_v29 = vadd.f32 1e-08, %v236_v10  ;;  %1773 = vmatpush1.bf16.msra.mxu0 %v1772_v27  ;;  %v679_v10 = vld [vmem:[%s3082_s3 + $0x68] sm:$0xff] }
 0x101   :  { %528 = vrot.lane.b32.xlu1 %v2184_v20, %s1892_s0  ;;  %1774 = vmatprep.subr.bf16.mxu0 %v1895_v2 }
 0x102   :  { %1859 = vrsqrt.f32 %v237_v28  ;;  %vm241_vm12 = vcmp.eq.f32.partialorder %v237_v28, inf  ;;  %v244_v40 = vand.u32 2147483648, %v237_v28  ;;  %vm243_vm13 = vcmp.eq.f32.partialorder %v237_v28, 0.0 }
 0x103   :  { %1861 = vrsqrt.f32 %v238_v29  ;;  %vm248_vm14 = vcmp.eq.f32.partialorder %v238_v29, inf  ;;  %v251_v62 = vand.u32 2147483648, %v238_v29  ;;  %vm250_vm15 = vcmp.eq.f32.partialorder %v238_v29, 0.0 }
 0x104   :  { %434 = vrot.lane.b32.xlu0 %v2188_v17, %s1893_s21  ;;  %v670_v17 = vld [vmem:[%s3082_s3 + $0x20] sm:$0xff]  ;;  %1776 = vmatpush1.bf16.msra.mxu0 %v1775_v43 }
 0x105   :  { %552 = vrot.lane.b32.xlu1 %v2155_v3, %s1894_s4  ;;  %v1778_v50 = vpack.c.bf16 %v671_v46, %v670_v17  ;;  %1777 = vmatprep.subr.bf16.mxu0 %v1895_v2  ;;  %v673_v3 = vld [vmem:[%s3082_s3 + $0x38] sm:$0xff] }
 0x108   :  { %470 = vrot.lane.b32.xlu0 %v2123_v55, %s1888_s28  ;;  %v672_v55 = vld [vmem:[%s3082_s3 + $0x30] sm:$0xff]  ;;  %1779 = vmatpush1.bf16.msra.mxu0 %v1778_v50 }
 0x109   :  { %468 = vrot.lane.b32.xlu1 %v2131_v60, %s1888_s28  ;;  %v1781_v60 = vpack.c.bf16 %v673_v3, %v672_v55  ;;  %1780 = vmatprep.subr.bf16.mxu0 %v1895_v2 }
 0x10c   :  { %498 = vrot.lane.b32.xlu0 %v2194_v24, %s1890_s10  ;;  %v1860_v35 = vpop.eup %1859  ;;  %1782 = vmatpush1.bf16.msra.mxu0 %v1781_v60 }
 0x10d   :  { %372 = vrot.lane.b32.xlu1 %v2198_v25, %s1889_s19  ;;  %v1862_v51 = vpop.eup %1861  ;;  %v240_v24 = vmul.f32 %v1860_v35, %v237_v28  ;;  %1783 = vmatprep.subr.bf16.mxu0 %v1895_v2 }
 0x10e   :  { %v247_v36 = vmul.f32 %v1862_v51, %v238_v29 }
 0x10f   :  { %v242_v54 = vsel %vm241_vm12, %v237_v28, %v240_v24  ;;  %v681_v28 = vld [vmem:[%s3082_s3 + $0x78] sm:$0xff] }
 0x110   :  { %530 = vrot.lane.b32.xlu0 %v2206_v30, %s1892_s0  ;;  %v245_v56 = vsel %vm243_vm13, %v244_v40, %v242_v54  ;;  %v249_v59 = vsel %vm248_vm14, %v238_v29, %v247_v36  ;;  %1785 = vmatpush1.bf16.msra.mxu0 %v1784_v53  ;;  %v682_v29 = vld [vmem:[%s3082_s3 + $0x80] sm:$0xff] }
 0x111   :  { %404 = vrot.lane.b32.xlu1 %v2214_v39, %s1891_s20  ;;  %v252_v0 = vsel %vm250_vm15, %v251_v62, %v249_v59  ;;  %v254_v47 = vsel %vm253_vm11, %v245_v56, 0.0  ;;  %1786 = vmatprep.subr.bf16.mxu0 %v1895_v2  ;;  %vm1896_vm15 = vmmov 0  }
 0x112   :  { %v255_v4 = vsel %vm253_vm11, %v252_v0, 0.0 }
 0x113   :  { %v2414_v7 = vadd.f32 %v255_v4, %v254_v47 }
 0x114   :  { %554 = vrot.lane.b32.xlu0 %v2198_v25, %s1894_s4  ;;  %v1787_v25 = vpack.c.bf16 %v677_v14, %v676_v38 }
 0x115   :  { %436 = vrot.lane.b32.xlu1 %v2218_v41, %s1893_s21  ;;  %v678_v41 = vld [vmem:[%s3082_s3 + $0x60] sm:$0xff] }
 0x116   :  { %1788 = vmatpush1.bf16.msra.mxu0 %v1787_v25  ;;  %v1790_v27 = vpack.c.bf16 %v679_v10, %v678_v41 }
 0x117   :  { %1789 = vmatprep.subr.bf16.mxu0 %v1895_v2 }
 0x118   :  { %374 = vrot.lane.b32.xlu0 %v2222_v42, %s1889_s19 }
 0x119   :  { %500 = vrot.lane.b32.xlu1 %v2229_v44, %s1890_s10  ;;  %v680_v44 = vld [vmem:[%s3082_s3 + $0x70] sm:$0xff] }
 0x11a   :  { %1791 = vmatpush1.bf16.msra.mxu0 %v1790_v27  ;;  %v1793_v34 = vpack.c.bf16 %v681_v28, %v680_v44 }
 0x11b   :  { %1792 = vmatprep.subr.bf16.mxu0 %v1895_v2 }
 0x11c   :  { %406 = vrot.lane.b32.xlu0 %v2233_v45, %s1891_s20 }
 0x11d   :  { %532 = vrot.lane.b32.xlu1 %v2238_v49, %s1892_s0 }
 0x11e   :  { %1794 = vmatpush1.bf16.msra.mxu0 %v1793_v34 }
 0x11f   :  { %1795 = vmatprep.subr.bf16.mxu0 %v1895_v2 }
 0x120   :  { %438 = vrot.lane.b32.xlu0 %v2244_v52, %s1893_s21  ;;  %v683_v52 = vld [vmem:[%s3082_s3 + $0x88] sm:$0xff] }
 0x121   :  { %556 = vrot.lane.b32.xlu1 %v2222_v42, %s1894_s4  ;;  %v1796_v42 = vpack.c.bf16 %v683_v52, %v682_v29 }
 0x123   :  { %1797 = vmatpush1.bf16.msra.mxu0 %v1796_v42 }
 0x124   :  { %364 = vrot.lane.b32.xlu0 %v2254_v57, %s1889_s19 }
 0x125   :  { %472 = vrot.lane.b32.xlu1 %v2169_v13, %s1888_s28 }
 0x128   :  { %396 = vrot.lane.b32.xlu0 %v2260_v58, %s1891_s20 }
 0x129   :  { %428 = vrot.lane.b32.xlu1 %v2270_v31, %s1893_s21 }
 0x12c   :  { %474 = vrot.lane.b32.xlu0 %v2163_v8, %s1888_s28 }
 0x12d   :  { %506 = vrot.lane.b32.xlu1 %v2276_v33, %s1890_s10 }
 0x130   :  { %502 = vrot.lane.b32.xlu0 %v2280_v61, %s1890_s10 }
 0x131   :  { %376 = vrot.lane.b32.xlu1 %v2284_v5, %s1889_s19 }
 0x134   :  { %534 = vrot.lane.b32.xlu0 %v2288_v6, %s1892_s0 }
 0x135   :  { %408 = vrot.lane.b32.xlu1 %v2305_v11, %s1891_s20 }
 0x138   :  { %558 = vrot.lane.b32.xlu0 %v2284_v5, %s1894_s4 }
 0x139   :  { %440 = vrot.lane.b32.xlu1 %v2309_v12, %s1893_s21 }
 0x13c   :  { %378 = vrot.lane.b32.xlu0 %v2294_v32, %s1889_s19 }
 0x13d   :  { %504 = vrot.lane.b32.xlu1 %v2298_v9, %s1890_s10 }
 0x140   :  { %410 = vrot.lane.b32.xlu0 %v2313_v18, %s1891_s20 }
 0x141   :  { %536 = vrot.lane.b32.xlu1 %v2323_v22, %s1892_s0 }
 0x144   :  { %442 = vrot.lane.b32.xlu0 %v2317_v19, %s1893_s21 }
 0x145   :  { %560 = vrot.lane.b32.xlu1 %v2294_v32, %s1894_s4 }
 0x148   :  { %538 = vrot.lane.b32.xlu0 %v2329_v26, %s1892_s0 }
 0x149   :  { %562 = vrot.lane.b32.xlu1 %v2254_v57, %s1894_s4 }
 0x14e   :  { %v463_v8 = vpop.permute.xlu0 %462 }
 0x14f   :  { %v461_v13 = vpop.permute.xlu1 %460 }
 0x152   :  { %v367_v31 = vpop.permute.xlu0 %366 }
 0x153   :  { %v493_v33 = vpop.permute.xlu1 %492  ;;  %v573_v9 = vsel %vm253_vm11, %v2109_v48, %v367_v31  ;;  %v634_v31 = vld [vmem:[%s3090_s11] sm:$0xff] }
 0x156   :  { %v399_v61 = vpop.permute.xlu0 %398 }
 0x157   :  { %v525_v5 = vpop.permute.xlu1 %524  ;;  %v582_v12 = vsel %vm580_vm0, %v573_v9, %v399_v61  ;;  %v637_v9 = vld [vmem:[%s3090_s11 + $0x18] sm:$0xff] }
 0x15a   :  { %v431_v32 = vpop.permute.xlu0 %430 }
 0x15b   :  { %v591_v19 = vsel %vm589_vm1, %v582_v12, %v431_v32  ;;  %v549_v37 = vpop.permute.xlu1 %548 }
 0x15c   :  { %v600_v12 = vsel %vm598_vm2, %v591_v19, %v463_v8  ;;  %v636_v8 = vld [vmem:[%s3090_s11 + $0x10] sm:$0xff] }
 0x15e   :  { %v2494_v43 = vpop.permute.xlu0 %466 }
 0x15f   :  { %v465_v57 = vpop.permute.xlu1 %464 }
 0x162   :  { %v495_v17 = vpop.permute.xlu0 %494 }
 0x163   :  { %v369_v46 = vpop.permute.xlu1 %368 }
 0x164   :  { %v574_v42 = vsel %vm253_vm11, %v2141_v63, %v369_v46  ;;  %v609_v46 = vsel %vm607_vm3, %v600_v12, %v495_v17  ;;  %v639_v17 = vld [vmem:[%s3090_s11 + $0x28] sm:$0xff] }
 0x166   :  { %v527_v50 = vpop.permute.xlu0 %526 }
 0x167   :  { %v401_v55 = vpop.permute.xlu1 %400  ;;  %257 = vadd.xlane.f32.xlu0 %v2414_v7 }
 0x16a   :  { %v551_v3 = vpop.permute.xlu0 %550 }
 0x16b   :  { %v433_v60 = vpop.permute.xlu1 %432 }
 0x16e   :  { %v371_v35 = vpop.permute.xlu0 %370 }
 0x16f   :  { %v497_v51 = vpop.permute.xlu1 %496 }
 0x172   :  { %v403_v48 = vpop.permute.xlu0 %402 }
 0x173   :  { %v529_v24 = vpop.permute.xlu1 %528 }
 0x176   :  { %v435_v21 = vpop.permute.xlu0 %434 }
 0x177   :  { %v553_v23 = vpop.permute.xlu1 %552 }
 0x17a   :  { %v2497_v40 = vpop.permute.xlu0 %470 }
 0x17b   :  { %v2499_v36 = vpop.permute.xlu1 %468 }
 0x17e   :  { %v2501_v53 = vpop.permute.xlu0 %498 }
 0x17f   :  { %v373_v54 = vpop.permute.xlu1 %372 }
 0x182   :  { %v2503_v62 = vpop.permute.xlu0 %530 }
 0x183   :  { %v405_v56 = vpop.permute.xlu1 %404 }
 0x186   :  { %v2505_v59 = vpop.permute.xlu0 %554 }
 0x187   :  { %v437_v0 = vpop.permute.xlu1 %436 }
 0x18a   :  { %v2507_v47 = vpop.permute.xlu0 %374 }
 0x18b   :  { %v2509_v4 = vpop.permute.xlu1 %500 }
 0x18e   :  { %v2511_v38 = vpop.permute.xlu0 %406 }
 0x18f   :  { %v2513_v14 = vpop.permute.xlu1 %532 }
 0x192   :  { %v2515_v7 = vpop.permute.xlu0 %438 }
 0x193   :  { %v2517_v25 = vpop.permute.xlu1 %556 }
 0x196   :  { %v365_v41 = vpop.permute.xlu0 %364 }
 0x197   :  { %v2519_v10 = vpop.permute.xlu1 %472  ;;  %v572_v27 = vsel %vm253_vm11, %v2329_v26, %v365_v41 }
 0x19a   :  { %v397_v44 = vpop.permute.xlu0 %396 }
 0x19b   :  { %v581_v28 = vsel %vm580_vm0, %v572_v27, %v397_v44  ;;  %v429_v29 = vpop.permute.xlu1 %428  ;;  %v618_v27 = vsel %vm616_vm4, %v609_v46, %v527_v50 }
 0x19c   :  { %v590_v34 = vsel %vm589_vm1, %v581_v28, %v429_v29  ;;  %v653_v28 = vmul.f32 %v637_v9, %v2147_v1  ;;  %v627_v19 = vsel %vm625_vm5, %v618_v27, %v551_v3 }
 0x19d   :  { %v599_v52 = vsel %vm598_vm2, %v590_v34, %v461_v13  ;;  %v583_v13 = vsel %vm580_vm0, %v574_v42, %v401_v55  ;;  %v652_v3 = vmul.f32 %v636_v8, %v627_v19  ;;  %v638_v34 = vld [vmem:[%s3090_s11 + $0x20] sm:$0xff] }
 0x19e   :  { %v608_v26 = vsel %vm607_vm3, %v599_v52, %v493_v33  ;;  %v2532_v61 = vpop.permute.xlu0 %474  ;;  %v592_v41 = vsel %vm589_vm1, %v583_v13, %v433_v60 }
 0x19f   :  { %v617_v63 = vsel %vm616_vm4, %v608_v26, %v525_v5  ;;  %v2540_v32 = vpop.permute.xlu1 %506  ;;  %v575_v5 = vsel %vm253_vm11, %v2184_v20, %v371_v35  ;;  %v655_v35 = vmul.f32 %v639_v17, %v2177_v15 }
 0x1a0   :  { %v626_v33 = vsel %vm625_vm5, %v617_v63, %v549_v37  ;;  %v601_v37 = vsel %vm598_vm2, %v592_v41, %v465_v57  ;;  %v584_v50 = vsel %vm580_vm0, %v575_v5, %v403_v48  ;;  %v576_v48 = vsel %vm253_vm11, %v2206_v30, %v373_v54 }
 0x1a1   :  { %v650_v44 = vmul.f32 %v634_v31, %v626_v33  ;;  %v610_v60 = vsel %vm607_vm3, %v601_v37, %v497_v51  ;;  %v593_v29 = vsel %vm589_vm1, %v584_v50, %v435_v21  ;;  %v641_v51 = vld [vmem:[%s3090_s11 + $0x38] sm:$0xff]  ;;  %v2581_v31 = vpop.f32.mrb[0].mxu1 }
 0x1a2   :  { %v503_v55 = vpop.permute.xlu0 %502  ;;  %v619_v20 = vsel %vm616_vm4, %v610_v60, %v529_v24  ;;  %v602_v21 = vsel %vm598_vm2, %v593_v29, %v2494_v43  ;;  %v585_v24 = vsel %vm580_vm0, %v576_v48, %v405_v56  ;;  %v657_v26 = vmul.f32 %v641_v51, %v2214_v39  ;;  %v640_v43 = vld [vmem:[%s3090_s11 + $0x30] sm:$0xff]  ;;  %v2592_v9 = vpop.f32.mrb[1].mxu1 }
 0x1a3   :  { %926 = vmatmul.mubr.f32.vlgmr.msra.gmra.mrb[8].mxu0 %v650_v44  ;;  %v377_v1 = vpop.permute.xlu1 %376  ;;  %v628_v57 = vsel %vm625_vm5, %v619_v20, %v553_v23  ;;  %v611_v42 = vsel %vm607_vm3, %v602_v21, %v2501_v53  ;;  %v594_v23 = vsel %vm589_vm1, %v585_v24, %v437_v0  ;;  %v577_v53 = vsel %vm253_vm11, %v2238_v49, %v2507_v47  ;;  %v2608_v46 = vpop.f32.mrb[2].mxu1 }
 0x1a4   :  { %1613 = vmatprep.mubr.msk.f32.mxu0 %vm253_vm11, %v653_v28  ;;  %v654_v30 = vmul.f32 %v638_v34, %v628_v57  ;;  %v620_v54 = vsel %vm616_vm4, %v611_v42, %v2503_v62  ;;  %v643_v62 = vld [vmem:[%s3090_s11 + $0x48] sm:$0xff]  ;;  %v603_v39 = vsel %vm598_vm2, %v594_v23, %v2499_v36  ;;  %v586_v12 = vsel %vm580_vm0, %v577_v53, %v2511_v38  ;;  %v642_v38 = vld [vmem:[%s3090_s11 + $0x40] sm:$0xff]  ;;  %v2616_v33 = vpop.f32.mrb[3].mxu1 }
 0x1a5   :  { %v629_v56 = vsel %vm625_vm5, %v620_v54, %v2505_v59  ;;  %v612_v59 = vsel %vm607_vm3, %v603_v39, %v2509_v4  ;;  %v595_v49 = vsel %vm589_vm1, %v586_v12, %v2515_v7  ;;  %v659_v36 = vmul.f32 %v643_v62, %v2233_v45  ;;  %v645_v7 = vld [vmem:[%s3090_s11 + $0x58] sm:$0xff]  ;;  %v1737_v60 = vpop.f32.mrb[4].mxu1  ;;  %v646_v34 = vld [vmem:[%s3090_s11 + $0x60] sm:$0xff]  ;;  %v648_v54 = vld [vmem:[%s3090_s11 + $0x70] sm:$0xff] }
 0x1a6   :  { %v535_v52 = vpop.permute.xlu0 %534  ;;  %v656_v47 = vmul.f32 %v640_v43, %v629_v56  ;;  %v621_v63 = vsel %vm616_vm4, %v612_v59, %v2513_v14  ;;  %v604_v14 = vsel %vm598_vm2, %v595_v49, %v2497_v40  ;;  %v578_v44 = vsel %vm253_vm11, %v2288_v6, %v377_v1  ;;  %v644_v40 = vld [vmem:[%s3090_s11 + $0x50] sm:$0xff]  ;;  %v647_v6 = vld [vmem:[%s3090_s11 + $0x68] sm:$0xff]  ;;  %v2649_v57 = vpop.f32.mrb[5].mxu1 }
 0x1a7   :  { %v409_v15 = vpop.permute.xlu1 %408  ;;  %931 = vmatmul.mubr.f32.gmra.mrb[10].mxu0 %v652_v3  ;;  %v630_v4 = vsel %vm625_vm5, %v621_v63, %v2517_v25  ;;  %v613_v45 = vsel %vm607_vm3, %v604_v14, %v503_v55  ;;  %v661_v19 = vmul.f32 %v645_v7, %v2305_v11  ;;  %v663_v29 = vmul.f32 %v647_v6, %v2313_v18  ;;  %v1286_v63 = vld [vmem:[%s3085_s6 + $0x88] sm:$0xff]  ;;  %v1287_v7 = vld [vmem:[%s3085_s6 + $0x90] sm:$0xff]  ;;  %v1288_v14 = vld [vmem:[%s3085_s6 + $0x98] sm:$0xff] }
 0x1a8   :  { %1614 = vmatprep.mubr.msk.f32.mxu0 %vm253_vm11, %v655_v35  ;;  %v658_v25 = vmul.f32 %v642_v38, %v630_v4  ;;  %v622_v28 = vsel %vm616_vm4, %v613_v45, %v535_v52  ;;  %v587_v8 = vsel %vm580_vm0, %v578_v44, %v409_v15  ;;  %v1740_v52 = vpop.f32.mrb[6].mxu1  ;;  %v1270_v4 = vld [vmem:[%s3085_s6 + $0x8] sm:$0xff]  ;;  %v1802_v45 = vpack.c.bf16 %v1288_v14, %v1287_v7  ;;  %v1272_v44 = vld [vmem:[%s3085_s6 + $0x18] sm:$0xff]  ;;  %v1297_v7 = vld [vmem:[%s3085_s6 + $0xe0] sm:$0xff] }
 0x1a9   :  { %v2660_v24 = vpop.f32.mrb[7].mxu1  ;;  %v1298_v14 = vld [vmem:[%s3085_s6 + $0xe8] sm:$0xff] }
 0x1aa   :  { %v559_v0 = vpop.permute.xlu0 %558 }
 0x1ab   :  { %v441_v13 = vpop.permute.xlu1 %440  ;;  %936 = vmatmul.mubr.f32.gmra.mrb[12].mxu0 %v654_v30  ;;  %v631_v5 = vsel %vm625_vm5, %v622_v28, %v559_v0 }
 0x1ac   :  { %1615 = vmatprep.mubr.msk.f32.mxu0 %vm253_vm11, %v657_v26  ;;  %v596_v55 = vsel %vm589_vm1, %v587_v8, %v441_v13  ;;  %v660_v50 = vmul.f32 %v644_v40, %v631_v5  ;;  %v1289_v8 = vld [vmem:[%s3085_s6 + $0xa0] sm:$0xff] }
 0x1ad   :  { %v605_v1 = vsel %vm598_vm2, %v596_v55, %v2519_v10  ;;  %v1273_v40 = vld [vmem:[%s3085_s6 + $0x20] sm:$0xff] }
 0x1ae   :  { %v379_v41 = vpop.permute.xlu0 %378  ;;  %v2717_v55 = vld [vmem:[%s3084_s5] ss:$0 sm:$0xff] }
 0x1af   :  { %v505_v27 = vpop.permute.xlu1 %504  ;;  %941 = vmatmul.mubr.f32.gmra.mrb[14].mxu0 %v656_v47  ;;  %v579_v11 = vsel %vm253_vm11, %v2323_v22, %v379_v41  ;;  %v649_v22 = vld [vmem:[%s3090_s11 + $0x78] sm:$0xff]  ;;  %v1285_v47 = vld [vmem:[%s3085_s6 + $0x80] sm:$0xff] }
 0x1b0   :  { %1616 = vmatprep.mubr.msk.f32.mxu0 %vm253_vm11, %v659_v36  ;;  %v614_v3 = vsel %vm607_vm3, %v605_v1, %v505_v27  ;;  %v665_v23 = vmul.f32 %v649_v22, %v2260_v58  ;;  %v1269_v36 = vld [vmem:[%s3085_s6] sm:$0xff]  ;;  %v1798_v38 = vpack.c.bf16 %v1286_v63, %v1285_v47  ;;  %v1271_v27 = vld [vmem:[%s3085_s6 + $0x10] sm:$0xff] }
 0x1b1   :  { %v1800_v41 = vpack.c.bf16 %v1270_v4, %v1269_v36 }
 0x1b2   :  { %v411_v17 = vpop.permute.xlu0 %410  ;;  %1799 = vmatprep.subr.bf16.mxu1 %v1798_v38 }
 0x1b3   :  { %v537_v37 = vpop.permute.xlu1 %536  ;;  %946 = vmatmul.mubr.f32.gmra.mrb[16].mxu0 %v658_v25  ;;  %v588_v20 = vsel %vm580_vm0, %v579_v11, %v411_v17  ;;  %1801 = vmatpush3.bf16.msra.mxu1 %v1800_v41  ;;  %v1804_v25 = vpack.c.bf16 %v1272_v44, %v1271_v27  ;;  %v1274_v17 = vld [vmem:[%s3085_s6 + $0x28] sm:$0xff]  ;;  %v1281_v27 = vld [vmem:[%s3085_s6 + $0x60] sm:$0xff] }
 0x1b4   :  { %1617 = vmatprep.mubr.msk.f32.mxu0 %vm253_vm11, %v661_v19  ;;  %v623_v10 = vsel %vm616_vm4, %v614_v3, %v537_v37  ;;  %1803 = vmatprep.subr.bf16.mxu1 %v1802_v45  ;;  %v1290_v19 = vld [vmem:[%s3085_s6 + $0xa8] sm:$0xff]  ;;  %v1275_v3 = vld [vmem:[%s3085_s6 + $0x30] sm:$0xff] }
 0x1b5   :  { %v1282_v44 = vld [vmem:[%s3085_s6 + $0x68] sm:$0xff] }
 0x1b6   :  { %v443_v35 = vpop.permute.xlu0 %442 }
 0x1b7   :  { %v597_v48 = vsel %vm589_vm1, %v588_v20, %v443_v35  ;;  %v561_v18 = vpop.permute.xlu1 %560  ;;  %951 = vmatmul.mubr.f32.gmra.mrb[18].mxu0 %v660_v50  ;;  %1805 = vmatpush3.bf16.msra.mxu1 %v1804_v25  ;;  %v1808_v50 = vpack.c.bf16 %v1274_v17, %v1273_v40  ;;  %v1299_v40 = vld [vmem:[%s3085_s6 + $0xf0] sm:$0xff] }
 0x1b8   :  { %v606_v51 = vsel %vm598_vm2, %v597_v48, %v2532_v61  ;;  %v632_v21 = vsel %vm625_vm5, %v623_v10, %v561_v18  ;;  %1618 = vmatprep.mubr.msk.f32.mxu0 %vm253_vm11, %v663_v29  ;;  %v1292_v29 = vld [vmem:[%s3085_s6 + $0xb8] sm:$0xff] }
 0x1b9   :  { %v662_v15 = vmul.f32 %v646_v34, %v632_v21  ;;  %v615_v42 = vsel %vm607_vm3, %v606_v51, %v2540_v32  ;;  %v1276_v34 = vld [vmem:[%s3085_s6 + $0x38] sm:$0xff]  ;;  %v1293_v21 = vld [vmem:[%s3085_s6 + $0xc0] sm:$0xff] }
 0x1ba   :  { %v539_v30 = vpop.permute.xlu0 %538  ;;  %v1812_v48 = vpack.c.bf16 %v1276_v34, %v1275_v3 }
 0x1bb   :  { %v624_v26 = vsel %vm616_vm4, %v615_v42, %v539_v30  ;;  %v563_v61 = vpop.permute.xlu1 %562  ;;  %956 = vmatmul.mubr.f32.gmra.mrb[20].mxu0 %v662_v15  ;;  %v1294_v15 = vld [vmem:[%s3085_s6 + $0xc8] sm:$0xff]  ;;  %v1277_v42 = vld [vmem:[%s3085_s6 + $0x40] sm:$0xff] }
 0x1bc   :  { %v633_v43 = vsel %vm625_vm5, %v624_v26, %v563_v61  ;;  %1619 = vmatprep.mubr.msk.f32.mxu0 %vm253_vm11, %v665_v23  ;;  %v1814_v30 = vpack.c.bf16 %v1294_v15, %v1293_v21 }
 0x1bd   :  { %v664_v56 = vmul.f32 %v648_v54, %v633_v43 }
 0x1bf   :  { %961 = vmatmul.mubr.f32.gmra.mrb[22].mxu0 %v664_v56 }
 0x1f4   :  { %v258_v53 = vpop.xlane.xlu0 %257 }
 0x1f5   :  { %v259_v0 = vrot.slane %v258_v53, 4 }
 0x1f7   :  { %v260_v32 = vadd.f32 %v259_v0, %v258_v53 }
 0x1f9   :  { %v261_v62 = vrot.slane %v260_v32, 2 }
 0x1fb   :  { %v262_v58 = vadd.f32 %v261_v62, %v260_v32  ;;  %v1295_v32 = vld [vmem:[%s3085_s6 + $0xd0] sm:$0xff]  ;;  %v1296_v62 = vld [vmem:[%s3085_s6 + $0xd8] sm:$0xff] }
 0x1fd   :  { %v263_v39 = vrot.slane %v262_v58, 1 }
 0x1ff   :  { %v264_v12 = vadd.f32 %v263_v39, %v262_v58  ;;  %v1279_v58 = vld [vmem:[%s3085_s6 + $0x50] sm:$0xff] }
 0x201   :  { %1842 = vpush %v264_v12  ;;  %v1280_v12 = vld [vmem:[%s3085_s6 + $0x58] sm:$0xff] }
 0x202   :  { %v1820_v38 = vpack.c.bf16 %v1280_v12, %v1279_v58 }
 0x232   :  { %s1843_s24 = spop %1842 }
 0x233   :  { %s268_s11 = smul.f32 0.00390625, %s1843_s24 }
 0x235   :  { %v2671_v13 = vstv %s268_s11 }
 0x236   :  { %v2674_v59 = vmul.f32 %v1737_v60, %v2671_v13  ;;  %v2677_v49 = vmul.f32 %v1740_v52, %v2671_v13  ;;  %v829_v28 = vmul.f32 %v2671_v13, %v2592_v9  ;;  %v1806_v9 = vpack.c.bf16 %v1290_v19, %v1289_v8  ;;  %v1291_v60 = vld [vmem:[%s3085_s6 + $0xb0] sm:$0xff] }
 0x237   :  { %v830_v1 = vmul.f32 %v2581_v31, %v2671_v13  ;;  %v1810_v35 = vpack.c.bf16 %v1292_v29, %v1291_v60  ;;  %v831_v51 = vmul.f32 %v2671_v13, %v2616_v33  ;;  %v1278_v33 = vld [vmem:[%s3085_s6 + $0x48] sm:$0xff]  ;;  %v832_v0 = vmul.f32 %v2608_v46, %v2671_v13 }
 0x238   :  { %1807 = vmatprep.subr.bf16.mxu1 %v1806_v9  ;;  %v1816_v43 = vpack.c.bf16 %v1278_v33, %v1277_v42  ;;  %v1818_v46 = vpack.c.bf16 %v1296_v62, %v1295_v32  ;;  %v833_v4 = vmul.f32 %v2671_v13, %v2649_v57  ;;  %v1822_v57 = vpack.c.bf16 %v1298_v14, %v1297_v7 }
 0x239   :  { %1809 = vmatpush3.bf16.msra.mxu1 %v1808_v50  ;;  %v1824_v8 = vpack.c.bf16 %v1282_v44, %v1281_v27  ;;  %v1284_v50 = vld [vmem:[%s3085_s6 + $0x78] sm:$0xff] }
 0x23a   :  { %1811 = vmatprep.subr.bf16.mxu1 %v1810_v35 }
 0x23d   :  { %1813 = vmatpush3.bf16.msra.mxu1 %v1812_v48 }
 0x23e   :  { %1815 = vmatprep.subr.bf16.mxu1 %v1814_v30 }
 0x241   :  { %1817 = vmatpush3.bf16.msra.mxu1 %v1816_v43 }
 0x242   :  { %1819 = vmatprep.subr.bf16.mxu1 %v1818_v46 }
 0x245   :  { %1821 = vmatpush3.bf16.msra.mxu1 %v1820_v38  ;;  %v1238_v38 = vld [vmem:[%s3091_s12 + $0x8] sm:$0xff] }
 0x246   :  { %1823 = vmatprep.subr.bf16.mxu1 %v1822_v57 }
 0x249   :  { %1825 = vmatpush3.bf16.msra.mxu1 %v1824_v8 }
 0x276   :  { %v927_v5 = vpop.f32.mrb[8].mxu0 }
 0x277   :  { %v928_v6 = vadd.f32 %v927_v5, %v829_v28  ;;  %v929_v37 = vpop.f32.mrb[9].mxu0  ;;  %v1300_v5 = vld [vmem:[%s3085_s6 + $0xf8] sm:$0xff] }
 0x278   :  { %v1283_v37 = vld [vmem:[%s3085_s6 + $0x70] sm:$0xff] }
 0x279   :  { %v973_v11 = vadd.f32 %v2717_v55, %v928_v6  ;;  %v1826_v6 = vpack.c.bf16 %v1300_v5, %v1299_v40 }
 0x27a   :  { %v932_v20 = vpop.f32.mrb[10].mxu0 }
 0x27b   :  { %vm981_vm6 = vcmp.ge.f32.partialorder %v973_v11, 0.0  ;;  %v989_v31 = vmul.f32 0.2, %v973_v11  ;;  %v933_v22 = vadd.f32 %v932_v20, %v830_v1  ;;  %v934_v10 = vpop.f32.mrb[11].mxu0  ;;  %v835_v1 = vmul.f32 %v2671_v13, %v2660_v24  ;;  %1827 = vmatprep.subr.bf16.mxu1 %v1826_v6 }
 0x27d   :  { %v2737_v18 = vsel %vm981_vm6, %v973_v11, %v989_v31  ;;  %v974_v52 = vadd.f32 %v2717_v55, %v933_v22  ;;  %v1828_v11 = vpack.c.bf16 %v1284_v50, %v1283_v37 }
 0x27e   :  { %v937_v23 = vpop.f32.mrb[12].mxu0  ;;  %1013 = vrot.lane.b32.xlu1 %v2737_v18, %s1889_s19 }
 0x27f   :  { %vm982_vm7 = vcmp.ge.f32.partialorder %v974_v52, 0.0  ;;  %v990_v54 = vmul.f32 0.2, %v974_v52  ;;  %v938_v26 = vadd.f32 %v937_v23, %v831_v51  ;;  %v939_v61 = vpop.f32.mrb[13].mxu0  ;;  %1829 = vmatpush3.bf16.msra.mxu1 %v1828_v11  ;;  %v1239_v11 = vld [vmem:[%s3091_s12 + $0x10] sm:$0xff] }
 0x280   :  { %1830 = vmatprep.subr.bf16.mxu1 %v1895_v2 }
 0x281   :  { %v2756_v56 = vsel %vm982_vm7, %v974_v52, %v990_v54  ;;  %v975_v53 = vadd.f32 %v2717_v55, %v938_v26 }
 0x282   :  { %v942_v39 = vpop.f32.mrb[14].mxu0  ;;  %1063 = vrot.lane.b32.xlu0 %v2756_v56, %s1893_s21  ;;  %1037 = vrot.lane.b32.xlu1 %v2737_v18, %s1891_s20 }
 0x283   :  { %vm983_vm8 = vcmp.ge.f32.partialorder %v975_v53, 0.0  ;;  %v991_v47 = vmul.f32 0.2, %v975_v53  ;;  %v2777_v63 = vadd.f32 %v942_v39, %v832_v0  ;;  %v944_v36 = vpop.f32.mrb[15].mxu0 }
 0x284   :  { %v1237_v36 = vld [vmem:[%s3091_s12] sm:$0xff] }
 0x285   :  { %v2781_v41 = vsel %vm983_vm8, %v975_v53, %v991_v47  ;;  %v976_v10 = vadd.f32 %v2717_v55, %v2777_v63 }
 0x286   :  { %v947_v45 = vpop.f32.mrb[16].mxu0  ;;  %1065 = vrot.lane.b32.xlu0 %v2781_v41, %s1893_s21  ;;  %1061 = vrot.lane.b32.xlu1 %v2737_v18, %s1893_s21 }
 0x287   :  { %v948_v25 = vadd.f32 %v947_v45, %v833_v4  ;;  %v949_v28 = vpop.f32.mrb[17].mxu0  ;;  %v992_v52 = vmul.f32 0.2, %v976_v10  ;;  %vm984_vm12 = vcmp.ge.f32.partialorder %v976_v10, 0.0 }
 0x289   :  { %v977_v20 = vadd.f32 %v2717_v55, %v948_v25  ;;  %v2876_v21 = vsel %vm984_vm12, %v976_v10, %v992_v52 }
 0x28a   :  { %v952_v19 = vpop.f32.mrb[18].mxu0  ;;  %1089 = vrot.lane.b32.xlu0 %v2781_v41, %s1888_s28  ;;  %1085 = vrot.lane.b32.xlu1 %v2737_v18, %s1888_s28 }
 0x28b   :  { %v953_v9 = vadd.f32 %v952_v19, %v2674_v59  ;;  %v954_v17 = vpop.f32.mrb[19].mxu0  ;;  %v993_v34 = vmul.f32 0.2, %v977_v20  ;;  %vm985_vm9 = vcmp.ge.f32.partialorder %v977_v20, 0.0 }
 0x28d   :  { %v2819_v60 = vadd.f32 %v2717_v55, %v953_v9  ;;  %v2837_v22 = vsel %vm985_vm9, %v977_v20, %v993_v34 }
 0x28e   :  { %v957_v29 = vpop.f32.mrb[20].mxu0  ;;  %1113 = vrot.lane.b32.xlu0 %v2781_v41, %s1890_s10  ;;  %1109 = vrot.lane.b32.xlu1 %v2737_v18, %s1890_s10 }
 0x28f   :  { %v958_v59 = vadd.f32 %v957_v29, %v835_v1  ;;  %v959_v3 = vpop.f32.mrb[21].mxu0  ;;  %v994_v15 = vmul.f32 0.2, %v2819_v60  ;;  %vm986_vm14 = vcmp.ge.f32.partialorder %v2819_v60, 0.0  ;;  %v1240_v1 = vld [vmem:[%s3091_s12 + $0x18] sm:$0xff] }
 0x291   :  { %v2911_v23 = vsel %vm986_vm14, %v2819_v60, %v994_v15  ;;  %v1241_v15 = vld [vmem:[%s3091_s12 + $0x20] sm:$0xff] }
 0x292   :  { %v962_v35 = vpop.f32.mrb[22].mxu0  ;;  %1137 = vrot.lane.b32.xlu0 %v2781_v41, %s1892_s0  ;;  %1133 = vrot.lane.b32.xlu1 %v2737_v18, %s1892_s0 }
 0x293   :  { %v963_v24 = vadd.f32 %v962_v35, %v2677_v49  ;;  %v964_v13 = vpop.f32.mrb[23].mxu0  ;;  %v979_v49 = vadd.f32 %v2717_v55, %v958_v59 }
 0x295   :  { %v980_v31 = vadd.f32 %v2717_v55, %v963_v24  ;;  %v995_v48 = vmul.f32 0.2, %v979_v49  ;;  %vm987_vm10 = vcmp.ge.f32.partialorder %v979_v49, 0.0 }
 0x296   :  { %1161 = vrot.lane.b32.xlu0 %v2781_v41, %s1894_s4  ;;  %1157 = vrot.lane.b32.xlu1 %v2737_v18, %s1894_s4 }
 0x297   :  { %v2870_v51 = vsel %vm987_vm10, %v979_v49, %v995_v48  ;;  %v996_v55 = vmul.f32 0.2, %v980_v31  ;;  %vm988_vm13 = vcmp.ge.f32.partialorder %v980_v31, 0.0 }
 0x299   :  { %v2903_v42 = vsel %vm988_vm13, %v980_v31, %v996_v55  ;;  %v1242_v55 = vld [vmem:[%s3091_s12 + $0x28] sm:$0xff] }
 0x29a   :  { %1021 = vrot.lane.b32.xlu0 %v2837_v22, %s1889_s19  ;;  %1015 = vrot.lane.b32.xlu1 %v2756_v56, %s1889_s19 }
 0x29e   :  { %1045 = vrot.lane.b32.xlu0 %v2837_v22, %s1891_s20  ;;  %1039 = vrot.lane.b32.xlu1 %v2756_v56, %s1891_s20 }
 0x2a2   :  { %1069 = vrot.lane.b32.xlu0 %v2837_v22, %s1893_s21  ;;  %1087 = vrot.lane.b32.xlu1 %v2756_v56, %s1888_s28 }
 0x2a6   :  { %1093 = vrot.lane.b32.xlu0 %v2837_v22, %s1888_s28  ;;  %1111 = vrot.lane.b32.xlu1 %v2756_v56, %s1890_s10 }
 0x2aa   :  { %1117 = vrot.lane.b32.xlu0 %v2837_v22, %s1890_s10  ;;  %1135 = vrot.lane.b32.xlu1 %v2756_v56, %s1892_s0 }
 0x2ae   :  { %1141 = vrot.lane.b32.xlu0 %v2837_v22, %s1892_s0  ;;  %1159 = vrot.lane.b32.xlu1 %v2756_v56, %s1894_s4 }
 0x2b2   :  { %1165 = vrot.lane.b32.xlu0 %v2837_v22, %s1894_s4  ;;  %1017 = vrot.lane.b32.xlu1 %v2781_v41, %s1889_s19 }
 0x2b6   :  { %1025 = vrot.lane.b32.xlu0 %v2870_v51, %s1889_s19  ;;  %1041 = vrot.lane.b32.xlu1 %v2781_v41, %s1891_s20 }
 0x2ba   :  { %1049 = vrot.lane.b32.xlu0 %v2870_v51, %s1891_s20  ;;  %1019 = vrot.lane.b32.xlu1 %v2876_v21, %s1889_s19 }
 0x2be   :  { %1073 = vrot.lane.b32.xlu0 %v2870_v51, %s1893_s21  ;;  %1043 = vrot.lane.b32.xlu1 %v2876_v21, %s1891_s20 }
 0x2c2   :  { %1097 = vrot.lane.b32.xlu0 %v2870_v51, %s1888_s28  ;;  %1067 = vrot.lane.b32.xlu1 %v2876_v21, %s1893_s21 }
 0x2c6   :  { %1121 = vrot.lane.b32.xlu0 %v2870_v51, %s1890_s10  ;;  %1091 = vrot.lane.b32.xlu1 %v2876_v21, %s1888_s28 }
 0x2ca   :  { %1145 = vrot.lane.b32.xlu0 %v2870_v51, %s1892_s0  ;;  %1115 = vrot.lane.b32.xlu1 %v2876_v21, %s1890_s10 }
 0x2ce   :  { %1169 = vrot.lane.b32.xlu0 %v2870_v51, %s1894_s4  ;;  %1139 = vrot.lane.b32.xlu1 %v2876_v21, %s1892_s0 }
 0x2d2   :  { %1123 = vrot.lane.b32.xlu0 %v2903_v42, %s1890_s10  ;;  %1163 = vrot.lane.b32.xlu1 %v2876_v21, %s1894_s4 }
 0x2d6   :  { %1171 = vrot.lane.b32.xlu0 %v2903_v42, %s1894_s4  ;;  %1023 = vrot.lane.b32.xlu1 %v2911_v23, %s1889_s19 }
 0x2da   :  { %1047 = vrot.lane.b32.xlu1 %v2911_v23, %s1891_s20 }
 0x2de   :  { %1071 = vrot.lane.b32.xlu1 %v2911_v23, %s1893_s21 }
 0x2e2   :  { %1095 = vrot.lane.b32.xlu1 %v2911_v23, %s1888_s28 }
 0x2e6   :  { %1119 = vrot.lane.b32.xlu1 %v2911_v23, %s1890_s10 }
 0x2ea   :  { %1143 = vrot.lane.b32.xlu1 %v2911_v23, %s1892_s0 }
 0x2ee   :  { %1167 = vrot.lane.b32.xlu1 %v2911_v23, %s1894_s4 }
 0x2f0   :  { %v1014_v30 = vpop.permute.xlu1 %1013 }
 0x2f1   :  { %v1181_v62 = vsel %vm253_vm11, %v2737_v18, %v1014_v30 }
 0x2f2   :  { %1027 = vrot.lane.b32.xlu1 %v2903_v42, %s1889_s19 }
 0x2f4   :  { %v1064_v33 = vpop.permute.xlu0 %1063  ;;  %v1038_v54 = vpop.permute.xlu1 %1037 }
 0x2f5   :  { %v1189_v58 = vsel %vm580_vm0, %v1181_v62, %v1038_v54 }
 0x2f6   :  { %1051 = vrot.lane.b32.xlu1 %v2903_v42, %s1891_s20 }
 0x2f8   :  { %v1066_v26 = vpop.permute.xlu0 %1065  ;;  %v1062_v61 = vpop.permute.xlu1 %1061 }
 0x2f9   :  { %v1197_v12 = vsel %vm589_vm1, %v1189_v58, %v1062_v61 }
 0x2fa   :  { %1075 = vrot.lane.b32.xlu1 %v2903_v42, %s1893_s21 }
 0x2fc   :  { %v1090_v43 = vpop.permute.xlu0 %1089  ;;  %v1086_v53 = vpop.permute.xlu1 %1085 }
 0x2fd   :  { %v1205_v47 = vsel %vm598_vm2, %v1197_v12, %v1086_v53 }
 0x2fe   :  { %1099 = vrot.lane.b32.xlu1 %v2903_v42, %s1888_s28 }
 0x300   :  { %v1114_v0 = vpop.permute.xlu0 %1113  ;;  %v1110_v32 = vpop.permute.xlu1 %1109 }
 0x301   :  { %v1213_v63 = vsel %vm607_vm3, %v1205_v47, %v1110_v32 }
 0x302   :  { %1147 = vrot.lane.b32.xlu1 %v2903_v42, %s1892_s0 }
 0x304   :  { %v1138_v39 = vpop.permute.xlu0 %1137  ;;  %v1134_v46 = vpop.permute.xlu1 %1133 }
 0x305   :  { %v1221_v18 = vsel %vm616_vm4, %v1213_v63, %v1134_v46 }
 0x308   :  { %v1158_v4 = vpop.permute.xlu1 %1157  ;;  %v1162_v14 = vpop.permute.xlu0 %1161 }
 0x309   :  { %v1229_v7 = vsel %vm625_vm5, %v1221_v18, %v1158_v4 }
 0x30a   :  { %v1253_v27 = vmul.f32 %v1237_v36, %v1229_v7  ;;  %v1254_v45 = vmul.f32 %v1238_v38, %v1229_v7 }
 0x30c   :  { %1365 = vmatprep.mubr.f32.mxu1 %v1254_v45  ;;  %v1016_v57 = vpop.permute.xlu1 %1015  ;;  %v1022_v44 = vpop.permute.xlu0 %1021 }
 0x30d   :  { %1366 = vmatmul.mubr.f32.vlgmr.msra.gmra.mrb[8].mxu1 %v1253_v27  ;;  %v1182_v40 = vsel %vm253_vm11, %v2756_v56, %v1016_v57  ;;  %v1185_v58 = vsel %vm253_vm11, %v2837_v22, %v1022_v44  ;;  %v1246_v44 = vld [vmem:[%s3091_s12 + $0x48] sm:$0xff] }
 0x310   :  { %v1040_v25 = vpop.permute.xlu1 %1039  ;;  %v1046_v8 = vpop.permute.xlu0 %1045 }
 0x311   :  { %v1190_v5 = vsel %vm580_vm0, %v1182_v40, %v1040_v25 }
 0x312   :  { %v1198_v6 = vsel %vm589_vm1, %v1190_v5, %v1064_v33  ;;  %v1245_v5 = vld [vmem:[%s3091_s12 + $0x40] sm:$0xff] }
 0x314   :  { %v1088_v28 = vpop.permute.xlu1 %1087  ;;  %v1070_v9 = vpop.permute.xlu0 %1069 }
 0x315   :  { %v1206_v37 = vsel %vm598_vm2, %v1198_v6, %v1088_v28 }
 0x318   :  { %v1112_v19 = vpop.permute.xlu1 %1111  ;;  %v1094_v59 = vpop.permute.xlu0 %1093 }
 0x319   :  { %v1214_v50 = vsel %vm607_vm3, %v1206_v37, %v1112_v19 }
 0x31c   :  { %v1136_v17 = vpop.permute.xlu1 %1135  ;;  %v1118_v24 = vpop.permute.xlu0 %1117 }
 0x31d   :  { %v1222_v56 = vsel %vm616_vm4, %v1214_v50, %v1136_v17 }
 0x320   :  { %v1160_v60 = vpop.permute.xlu1 %1159  ;;  %v1142_v30 = vpop.permute.xlu0 %1141 }
 0x321   :  { %v1230_v29 = vsel %vm625_vm5, %v1222_v56, %v1160_v60 }
 0x322   :  { %v1255_v3 = vmul.f32 %v1239_v11, %v1230_v29  ;;  %v1256_v20 = vmul.f32 %v1240_v1, %v1230_v29 }
 0x324   :  { %1370 = vmatprep.mubr.f32.mxu1 %v1256_v20  ;;  %v1018_v35 = vpop.permute.xlu1 %1017 }
 0x325   :  { %1371 = vmatmul.mubr.f32.gmra.mrb[10].mxu1 %v1255_v3  ;;  %v1183_v13 = vsel %vm253_vm11, %v2781_v41, %v1018_v35 }
 0x328   :  { %v1042_v34 = vpop.permute.xlu1 %1041 }
 0x329   :  { %v1191_v31 = vsel %vm580_vm0, %v1183_v13, %v1042_v34 }
 0x32a   :  { %v1199_v49 = vsel %vm589_vm1, %v1191_v31, %v1066_v26 }
 0x32b   :  { %v1207_v10 = vsel %vm598_vm2, %v1199_v49, %v1090_v43  ;;  %v1166_v43 = vpop.permute.xlu0 %1165 }
 0x32c   :  { %v1215_v48 = vsel %vm607_vm3, %v1207_v10, %v1114_v0  ;;  %v1020_v52 = vpop.permute.xlu1 %1019 }
 0x32d   :  { %v1223_v41 = vsel %vm616_vm4, %v1215_v48, %v1138_v39  ;;  %v1184_v46 = vsel %vm253_vm11, %v2876_v21, %v1020_v52  ;;  %v1193_v39 = vsel %vm580_vm0, %v1185_v58, %v1046_v8  ;;  %v1243_v21 = vld [vmem:[%s3091_s12 + $0x30] sm:$0xff]  ;;  %v1248_v52 = vld [vmem:[%s3091_s12 + $0x58] sm:$0xff] }
 0x32e   :  { %v1231_v33 = vsel %vm625_vm5, %v1223_v41, %v1162_v14  ;;  %v1201_v36 = vsel %vm589_vm1, %v1193_v39, %v1070_v9  ;;  %v1244_v14 = vld [vmem:[%s3091_s12 + $0x38] sm:$0xff] }
 0x32f   :  { %v1258_v54 = vmul.f32 %v1242_v55, %v1231_v33  ;;  %v1257_v26 = vmul.f32 %v1241_v15, %v1231_v33  ;;  %v1026_v32 = vpop.permute.xlu0 %1025  ;;  %v1209_v18 = vsel %vm598_vm2, %v1201_v36, %v1094_v59 }
 0x330   :  { %v1044_v61 = vpop.permute.xlu1 %1043  ;;  %v1217_v7 = vsel %vm607_vm3, %v1209_v18, %v1118_v24  ;;  %v1187_v59 = vsel %vm253_vm11, %v2870_v51, %v1026_v32 }
 0x331   :  { %1375 = vmatprep.mubr.f32.mxu1 %v1258_v54  ;;  %v1192_v47 = vsel %vm580_vm0, %v1184_v46, %v1044_v61  ;;  %v1225_v27 = vsel %vm616_vm4, %v1217_v7, %v1142_v30  ;;  %v1250_v30 = vld [vmem:[%s3091_s12 + $0x68] sm:$0xff]  ;;  %v1251_v7 = vld [vmem:[%s3091_s12 + $0x70] sm:$0xff] }
 0x332   :  { %1376 = vmatmul.mubr.f32.gmra.mrb[12].mxu1 %v1257_v26  ;;  %v1233_v25 = vsel %vm625_vm5, %v1225_v27, %v1166_v43  ;;  %v1249_v43 = vld [vmem:[%s3091_s12 + $0x60] sm:$0xff] }
 0x333   :  { %v1050_v12 = vpop.permute.xlu0 %1049  ;;  %v1262_v9 = vmul.f32 %v1246_v44, %v1233_v25  ;;  %v1261_v6 = vmul.f32 %v1245_v5, %v1233_v25 }
 0x334   :  { %v1068_v53 = vpop.permute.xlu1 %1067  ;;  %v1195_v20 = vsel %vm580_vm0, %v1187_v59, %v1050_v12 }
 0x335   :  { %v1200_v38 = vsel %vm589_vm1, %v1192_v47, %v1068_v53 }
 0x337   :  { %v1074_v8 = vpop.permute.xlu0 %1073 }
 0x338   :  { %v1092_v0 = vpop.permute.xlu1 %1091  ;;  %v1203_v13 = vsel %vm589_vm1, %v1195_v20, %v1074_v8 }
 0x339   :  { %v1208_v4 = vsel %vm598_vm2, %v1200_v38, %v1092_v0 }
 0x33b   :  { %v1098_v37 = vpop.permute.xlu0 %1097 }
 0x33c   :  { %v1116_v62 = vpop.permute.xlu1 %1115  ;;  %v1211_v31 = vsel %vm598_vm2, %v1203_v13, %v1098_v37 }
 0x33d   :  { %v1216_v22 = vsel %vm607_vm3, %v1208_v4, %v1116_v62  ;;  %v1252_v4 = vld [vmem:[%s3091_s12 + $0x78] sm:$0xff] }
 0x33f   :  { %v1122_v1 = vpop.permute.xlu0 %1121 }
 0x340   :  { %v1140_v63 = vpop.permute.xlu1 %1139  ;;  %v1219_v48 = vsel %vm607_vm3, %v1211_v31, %v1122_v1 }
 0x341   :  { %v1224_v45 = vsel %vm616_vm4, %v1216_v22, %v1140_v63 }
 0x343   :  { %v1146_v60 = vpop.permute.xlu0 %1145 }
 0x344   :  { %v1164_v57 = vpop.permute.xlu1 %1163  ;;  %v1227_v55 = vsel %vm616_vm4, %v1219_v48, %v1146_v60  ;;  %v1406_v48 = vld [vmem:[%s3092_s13] sm:$0xf] }
 0x345   :  { %v1232_v28 = vsel %vm625_vm5, %v1224_v45, %v1164_v57  ;;  %v1897_v45 = vmov 0.0  }
 0x346   :  { %v1259_v19 = vmul.f32 %v1243_v21, %v1232_v28  ;;  %v1260_v40 = vmul.f32 %v1244_v14, %v1232_v28  ;;  %1760 = vmatprep.subr.mxu0 %v1897_v45  ;;  %1762 = vmatprep.mubr.msk.f32.mxu0 %vm1896_vm15, %v1897_v45 }
 0x347   :  { %v1170_v49 = vpop.permute.xlu0 %1169 }
 0x348   :  { %1380 = vmatprep.mubr.f32.mxu1 %v1260_v40  ;;  %v1024_v17 = vpop.permute.xlu1 %1023  ;;  %v1235_v33 = vsel %vm625_vm5, %v1227_v55, %v1170_v49 }
 0x349   :  { %1381 = vmatmul.mubr.f32.gmra.mrb[14].mxu1 %v1259_v19  ;;  %v1186_v3 = vsel %vm253_vm11, %v2911_v23, %v1024_v17  ;;  %v1247_v23 = vld [vmem:[%s3091_s12 + $0x50] sm:$0xff]  ;;  %v1266_v53 = vmul.f32 %v1250_v30, %v1235_v33  ;;  %v1265_v32 = vmul.f32 %v1249_v43, %v1235_v33  ;;  %v1490_v33 = vld [vmem:[%s3087_s8] sm:$0x1] }
 0x34a   :  { %1385 = vmatprep.mubr.f32.mxu1 %v1262_v9 }
 0x34b   :  { %v1124_v39 = vpop.permute.xlu0 %1123 }
 0x34c   :  { %v1048_v50 = vpop.permute.xlu1 %1047 }
 0x34d   :  { %1386 = vmatmul.mubr.f32.gmra.mrb[16].mxu1 %v1261_v6  ;;  %v1194_v35 = vsel %vm580_vm0, %v1186_v3, %v1048_v50 }
 0x350   :  { %v1072_v11 = vpop.permute.xlu1 %1071 }
 0x351   :  { %v1202_v34 = vsel %vm589_vm1, %v1194_v35, %v1072_v11 }
 0x354   :  { %v1096_v56 = vpop.permute.xlu1 %1095 }
 0x355   :  { %v1210_v10 = vsel %vm598_vm2, %v1202_v34, %v1096_v56 }
 0x358   :  { %v1120_v29 = vpop.permute.xlu1 %1119 }
 0x359   :  { %v1218_v51 = vsel %vm607_vm3, %v1210_v10, %v1120_v29 }
 0x35c   :  { %v1144_v24 = vpop.permute.xlu1 %1143 }
 0x35d   :  { %v1226_v15 = vsel %vm616_vm4, %v1218_v51, %v1144_v24  ;;  %v1491_v51 = vld [vmem:[#allocation2] sm:$0x1] }
 0x360   :  { %v1168_v41 = vpop.permute.xlu1 %1167 }
 0x361   :  { %v1234_v54 = vsel %vm625_vm5, %v1226_v15, %v1168_v41 }
 0x362   :  { %v1263_v26 = vmul.f32 %v1247_v23, %v1234_v54  ;;  %v1264_v61 = vmul.f32 %v1248_v52, %v1234_v54  ;;  %v1898_v23 = vmov 0   ;;  %v1499_v54 = vsub.s32 0, %v2026_v16 }
 0x363   :  { %1857 = vset.pattern.permute.xlu1 %v1898_v23  ;;  %1858 = vset.pattern.permute.xlu0 %v1898_v23 }
 0x364   :  { %1390 = vmatprep.mubr.f32.mxu1 %v1264_v61  ;;  %v1028_v0 = vpop.permute.xlu1 %1027  ;;  %1494 = vperm.xlu1 %1857, %v1491_v51  }
 0x365   :  { %1391 = vmatmul.mubr.f32.gmra.mrb[18].mxu1 %v1263_v26  ;;  %v1188_v46 = vsel %vm253_vm11, %v2903_v42, %v1028_v0  ;;  %v1172_v42 = vpop.permute.xlu0 %1171 }
 0x366   :  { %1395 = vmatprep.mubr.f32.mxu1 %v1266_v53 }
 0x368   :  { %v1052_v62 = vpop.permute.xlu1 %1051 }
 0x369   :  { %1396 = vmatmul.mubr.f32.gmra.mrb[20].mxu1 %v1265_v32  ;;  %v1196_v12 = vsel %vm580_vm0, %v1188_v46, %v1052_v62 }
 0x36c   :  { %v1076_v58 = vpop.permute.xlu1 %1075 }
 0x36d   :  { %v1204_v47 = vsel %vm589_vm1, %v1196_v12, %v1076_v58  ;;  %vm1577_vm1 = vcmask 24576  }
 0x370   :  { %v1100_v63 = vpop.permute.xlu1 %1099 }
 0x371   :  { %v1212_v36 = vsel %vm598_vm2, %v1204_v47, %v1100_v63 }
 0x372   :  { %v1220_v38 = vsel %vm607_vm3, %v1212_v36, %v1124_v39 }
 0x374   :  { %v1148_v18 = vpop.permute.xlu1 %1147 }
 0x375   :  { %v1228_v22 = vsel %vm616_vm4, %v1220_v38, %v1148_v18 }
 0x376   :  { %v1236_v21 = vsel %vm625_vm5, %v1228_v22, %v1172_v42 }
 0x377   :  { %v1268_v14 = vmul.f32 %v1252_v4, %v1236_v21  ;;  %v1267_v27 = vmul.f32 %v1251_v7, %v1236_v21 }
 0x379   :  { %1400 = vmatprep.mubr.f32.mxu1 %v1268_v14 }
 0x37a   :  { %1401 = vmatmul.mubr.f32.gmra.mrb[22].mxu1 %v1267_v27 }
 0x37b   :  { %1757 = vmatprep.mubr.msk.f32.mxu1 %vm1896_vm15, %v1897_v45 }
 0x3e0   :  { %v1676_v57 = vpop.f32.mrb[8].mxu1 }
 0x3e1   :  { %v1677_v44 = vpop.f32.mrb[9].mxu1 }
 0x3e2   :  { %v1678_v25 = vadd.f32 %v1677_v44, %v1676_v57 }
 0x3e3   :  { %v1495_v26 = vpop.permute.xlu1 %1494 }
 0x3e4   :  { %v1500_v61 = vrot.slane %v1495_v26, %v1499_v54 }
 0x3f8   :  { %v1679_v28 = vpop.f32.mrb[10].mxu1 }
 0x3f9   :  { %v1680_v8 = vpop.f32.mrb[11].mxu1 }
 0x3fa   :  { %v1681_v19 = vadd.f32 %v1680_v8, %v1679_v28 }
 0x3fc   :  { %v1831_v40 = vpack.c.bf16 %v1681_v19, %v1678_v25 }
 0x3fe   :  { %1832 = vmatpush3.bf16.msra.mxu1 %v1831_v40 }
 0x3ff   :  { %1833 = vmatprep.subr.bf16.mxu1 %v1895_v2 }
 0x405   :  { %v1682_v5 = vpop.f32.mrb[12].mxu1 }
 0x406   :  { %v1683_v9 = vpop.f32.mrb[13].mxu1 }
 0x407   :  { %v1684_v17 = vadd.f32 %v1683_v9, %v1682_v5 }
 0x41c   :  { %v1685_v6 = vpop.f32.mrb[14].mxu1 }
 0x41d   :  { %v1686_v37 = vpop.f32.mrb[15].mxu1 }
 0x41e   :  { %v1687_v50 = vadd.f32 %v1686_v37, %v1685_v6 }
 0x420   :  { %v1834_v11 = vpack.c.bf16 %v1687_v50, %v1684_v17  ;;  %v1688_v1 = vpop.f32.mrb[16].mxu1 }
 0x421   :  { %v1689_v56 = vpop.f32.mrb[17].mxu1 }
 0x422   :  { %v1690_v60 = vadd.f32 %v1689_v56, %v1688_v1  ;;  %1835 = vmatpush3.bf16.msra.mxu1 %v1834_v11 }
 0x423   :  { %1836 = vmatprep.subr.bf16.mxu1 %v1895_v2 }
 0x438   :  { %v1691_v29 = vpop.f32.mrb[18].mxu1 }
 0x439   :  { %v1692_v59 = vpop.f32.mrb[19].mxu1 }
 0x43a   :  { %v1693_v3 = vadd.f32 %v1692_v59, %v1691_v29 }
 0x43c   :  { %v1837_v20 = vpack.c.bf16 %v1693_v3, %v1690_v60  ;;  %v1694_v35 = vpop.f32.mrb[20].mxu1 }
 0x43d   :  { %v1695_v24 = vpop.f32.mrb[21].mxu1 }
 0x43e   :  { %v1696_v13 = vadd.f32 %v1695_v24, %v1694_v35  ;;  %1838 = vmatpush3.bf16.msra.mxu1 %v1837_v20 }
 0x43f   :  { %1839 = vmatprep.subr.bf16.mxu1 %v1895_v2  ;;  %v1621_v2 = vld [vmem:[%s3086_s7] ss:$0 sm:$0xff]  ;;  %s1585_s7 = sshll.u32 %s1899_s23, 4  ;;  %s1586_s7 = int_to_ptr.vmem [resolvable:$true] %s1585_s7 }
 0x440   :  { %s1863_s24 = scalar_lea.vmem %s1586_s7, 16  ;;  %s1867_s11 = scalar_lea.vmem %s1586_s7, 32 }
 0x441   :  { %p1864_p0 = scmp.ne.s32.totalorder %s1586_s7, %s1863_s24  ;;  %p1868_p1 = scmp.lt.s32.totalorder %s1586_s7, %s1586_s7 }
 0x442   :  { %p1869_p2 = scmp.lt.s32.totalorder %s1867_s11, %s1863_s24 }
 0x444   :  { %p1870_p3 = por %p1869_p2, %p1868_p1 }
 0x446   :  { %p1871_p4 = pnand %p1870_p3, %p1864_p0 }
 0x44d   :  { %v1697_v34 = vpop.f32.mrb[22].mxu1 }
 0x44e   :  { %v1698_v31 = vpop.f32.mrb[23].mxu1 }
 0x44f   :  { %v1699_v49 = vadd.f32 %v1698_v31, %v1697_v34 }
 0x451   :  { %v1840_v10 = vpack.c.bf16 %v1699_v49, %v1696_v13 }
 0x453   :  { %1841 = vmatpush3.bf16.msra.mxu1 %v1840_v10 }
 0x456   :  { %1758 = vmatmul.mubr.msk.f32.vlgmr.msra.gmra.mrb[24].mxu1 %vm598_vm2, %v1406_v48 }
 0x529   :  { %v1483_v52 = vpop.f32.mrb[24].mxu1 }
 0x52a   :  { %v1484_v55 = vadd.f32 %v1621_v2, %v1483_v52  ;;  %v1759_v15 = vpop.f32.mrb[25].mxu1 }
 0x52c   :  { %vm1487_vm0 = vcmp.ge.f32.partialorder %v1484_v55, 0.0  ;;  %v1488_v41 = vmul.f32 0.2, %v1484_v55 }
 0x52e   :  { %v1489_v30 = vsel %vm1487_vm0, %v1484_v55, %v1488_v41 }
 0x52f   :  { %1761 = vmatpush3.xpose.msk.msra.mxu0 %vm253_vm11, %v1489_v30 }
 0x532   :  { %1763 = vmatmul.mubr.msk.f32.vlgmr.msra.gmra.mrb[24].mxu0 %vm253_vm11, %v1490_v33 }
 0x605   :  { %v1573_v43 = vpop.f32.mrb[24].mxu0 }
 0x606   :  { %v1574_v53 = vadd.f32 %v1573_v43, %v1500_v61  ;;  %v1764_v0 = vpop.f32.mrb[25].mxu0 }
 0x608   :  { %1578 = vst.msk [vmem:[#allocation3] sm:$0x1] %vm1577_vm1, %v1574_v53 }
 0x609   :  { %1874 = shalt.err (!%p1871_p4)
}
 0x60a   :  { %s1875_s3 = scalar_lea.hbm %s3093_s14, 16 }
 0x60b   :  { %p1876_p5 = scmp.ne.s32.totalorder %s3093_s14, %s1875_s3  ;;  %p1879_p6 = scmp.lt.u32.totalorder %s1875_s3, %s3093_s14 }
 0x60d   :  { %p1881_p7 = pnand %p1879_p6, %p1876_p5 }
 0x60f   :  { %1884 = shalt.err (!%p1881_p7)
}
 0x610   :  { %1588 = dma.vmem_to_hbm [thread:$0]  %s1586_s7, 16, %s3093_s14, [#allocation4]  }
 0x611   :  { %1885 = dma.done.wait [#allocation4], 16  }
 0x612   :  { %1886 = vsyncadd [#allocation4], 4294967280 }
 0x613   :  { %1592 = vsyncpa [#allocation4], 1 }

</bundles_post_ra>
